<compile_context>
chip_gen: v7x
topology: tpu7x:2x2x1
jax: 0.10.0
libtpu: 0.0.40
codegen_flags: <defaults>
</compile_context>

<pallas_src>
import math

import jax
import jax.numpy as jnp
from jax.experimental import pallas as pl
from jax.experimental.pallas import tpu as pltpu

# ---------------- configuration (small synthetic shapes) ----------------
B = 2          # batch
N_TRACK = 16   # number of track tokens
N_DET = 16     # number of current-frame (detection) tokens
D_IN = 32      # input token feature dim
D_MODEL = 32   # embedding dim
TP_DIM = 4     # track-prediction head output dim (box deltas)

FOCAL_ALPHA = 0.25
FOCAL_GAMMA = 2.0          # implemented as a plain square below (gamma == 2)
NCE_TEMPERATURE = 0.1
NCE_WEIGHT = 0.1


def _sum2d(x):
    """Full reduction to (1, 1) using single-axis keepdims reduces."""
    return jnp.sum(jnp.sum(x, axis=1, keepdims=True), axis=0, keepdims=True)


# ---------------- fused Pallas kernel: STD forward + STDLoss ----------------
def _std_loss_kernel(x_ref, w_ec_ref, b_ec_ref, w_tp_ref, b_tp_ref,
                     tgt_ref, valid_ref,
                     enc_ref, cur_ref, tp_ref, conf_ref, loss_ref):
    f32 = jnp.float32
    neg_inf = f32(-1e9)
    inv_sqrt_d = f32(1.0 / math.sqrt(D_MODEL))
    inv_temp = f32(1.0 / NCE_TEMPERATURE)
    eps = f32(1e-6)
    BT = B * N_TRACK
    BD = B * N_DET

    # ---- STD (model): ONE fused MXU pass for both token encoders ----
    # x_ref is [xt ; xd] stacked along sublanes, w_ec is [w_enc | w_cur].
    big = jnp.dot(x_ref[...], w_ec_ref[...], preferred_element_type=f32) + b_ec_ref[...]
    enc = big[:BT, :D_MODEL]          # track rows  x  enc-weight columns
    cur = big[BT:, D_MODEL:]          # det rows    x  cur-weight columns
    tp = jnp.dot(enc, w_tp_ref[...], preferred_element_type=f32) + b_tp_ref[...]

    # Stores happen once; the batch loop below consumes the in-register values.
    enc_ref[...] = enc
    cur_ref[...] = cur
    tp_ref[...] = tp

    # ---- norms for the NCE cosine similarity, hoisted out of the batch loop ----
    inv_t_all = jax.lax.rsqrt(jnp.sum(enc * enc, axis=1, keepdims=True) + 1e-6)   # (B*Nt, 1)
    ones_row = jnp.ones((1, D_MODEL), f32)
    cnorm_sq_all = jax.lax.dot_general(
        ones_row, cur * cur, (((1,), (1,)), ((), ())),
        preferred_element_type=f32)                                               # (1, B*Nd)
    inv_c_all = jax.lax.rsqrt(cnorm_sq_all + 1e-6)

    # Tile accumulators (reduced to scalars ONCE after the loop).
    task_tile = jnp.zeros((N_TRACK, N_DET), f32)
    valid_tile = jnp.zeros((N_TRACK, N_DET), f32)
    nce_tile = jnp.zeros((N_TRACK, 1), f32)
    haspos_tile = jnp.zeros((N_TRACK, 1), f32)

    # Static unroll over the (tiny) batch; slices are on traced values (vregs).
    for b in range(B):
        te = enc[b * N_TRACK:(b + 1) * N_TRACK, :]        # (Nt, D)
        ce = cur[b * N_DET:(b + 1) * N_DET, :]            # (Nd, D)
        tgt = tgt_ref[b]                                   # (Nt, Nd) 0/1 GT assignment
        valid = valid_ref[b]                               # (Nt, Nd) mask outer product
        is_valid = valid > 0.0

        # Raw similarity — single MXU matmul, reused for conf matrix AND NCE.
        sim_raw = jax.lax.dot_general(
            te, ce, (((1,), (1,)), ((), ())), preferred_element_type=f32)

        # ---- confidence matrix: scaled similarity + dual softmax ----
        sim_m = jnp.where(is_valid, sim_raw * inv_sqrt_d, neg_inf)
        r_max = jnp.max(sim_m, axis=1, keepdims=True)
        r_exp = jnp.exp(sim_m - r_max)
        r_inv = pl.reciprocal(jnp.maximum(jnp.sum(r_exp, axis=1, keepdims=True), 1e-9),
                              approx=True)
        c_max = jnp.max(sim_m, axis=0, keepdims=True)
        c_exp = jnp.exp(sim_m - c_max)
        c_inv = pl.reciprocal(jnp.maximum(jnp.sum(c_exp, axis=0, keepdims=True), 1e-9),
                              approx=True)
        conf = r_exp * r_inv * c_exp * c_inv * valid
        conf_ref[b] = conf

        # ---- task loss: focal BCE (gamma == 2 -> square), pos/neg merged ----
        p = jnp.clip(conf, eps, 1.0 - eps)
        q = 1.0 - p
        focal = (-FOCAL_ALPHA) * (tgt * (q * q) * jnp.log(p)
                                  + (1.0 - tgt) * (p * p) * jnp.log(q)) * valid
        task_tile = task_tile + focal
        valid_tile = valid_tile + valid

        # ---- social NCE loss: InfoNCE on cosine sim, derived from sim_raw ----
        inv_t = inv_t_all[b * N_TRACK:(b + 1) * N_TRACK, :]   # (Nt, 1)
        inv_c = inv_c_all[:, b * N_DET:(b + 1) * N_DET]       # (1, Nd)
        s_m = jnp.where(is_valid, sim_raw * inv_t * inv_c * inv_temp, neg_inf)
        s_max = jnp.max(s_m, axis=1, keepdims=True)
        e = jnp.exp(s_m - s_max)
        denom = jnp.sum(e, axis=1, keepdims=True)              # (Nt, 1)
        numer = jnp.sum(e * tgt, axis=1, keepdims=True)        # (Nt, 1)
        has_pos = jnp.sum(tgt * valid, axis=1, keepdims=True) > 0.0
        loss_row = jnp.log(jnp.maximum(denom, 1e-9)) - jnp.log(jnp.maximum(numer, 1e-9))
        nce_tile = nce_tile + jnp.where(has_pos, loss_row, 0.0)
        haspos_tile = haspos_tile + has_pos.astype(f32)

    # ---- STDLoss final reduction (4 reductions total, done in-kernel) ----
    task_sum = _sum2d(task_tile)
    task_cnt = _sum2d(valid_tile)
    nce_sum = jnp.sum(nce_tile, axis=0, keepdims=True)         # (1, 1)
    nce_cnt = jnp.sum(haspos_tile, axis=0, keepdims=True)      # (1, 1)

    loss_task = task_sum / jnp.maximum(task_cnt, 1.0)          # (1, 1)
    loss_nce = nce_sum / jnp.maximum(nce_cnt, 1.0)             # (1, 1)
    # TODO(synk): reference STDLoss may also include a regression term on `tp`;
    # its definition is unavailable, so only matching (focal) + social-NCE terms
    # are reproduced here.
    total = loss_task + NCE_WEIGHT * loss_nce                  # (1, 1)

    # Single (3, 128) store: rows = [total, task, nce], lane-broadcast.
    lanes = jnp.zeros((1, 128), f32)
    loss_ref[...] = jnp.concatenate(
        [lanes + total, lanes + loss_task, lanes + loss_nce], axis=0)


# ---------------- parameter init (deterministic, synthetic) ----------------
def init_params():
    k = jax.random.PRNGKey(42)
    ks = jax.random.split(k, 3)
    scale = 0.02
    return {
        "w_enc": jax.random.normal(ks[0], (D_IN, D_MODEL), jnp.float32) * scale,
        "b_enc": jnp.zeros((D_MODEL,), jnp.float32),
        "w_cur": jax.random.normal(ks[1], (D_IN, D_MODEL), jnp.float32) * scale,
        "b_cur": jnp.zeros((D_MODEL,), jnp.float32),
        "w_tp": jax.random.normal(ks[2], (D_MODEL, TP_DIM), jnp.float32) * scale,
        "b_tp": jnp.zeros((TP_DIM,), jnp.float32),
    }


# ---------------- full forward: STD model + STDLoss (single pallas_call) ----------------
def std_with_loss_forward(params, track_tokens, det_tokens,
                          temp_token_mask, current_track_mask, targets):
    Bb, Nt, Din = track_tokens.shape
    Nd = det_tokens.shape[1]

    # Host-side (cheap XLA) plumbing that halves the number of tiny input DMAs.
    xt = track_tokens.reshape(Bb * Nt, Din)
    xd = det_tokens.reshape(Bb * Nd, Din)
    x_all = jnp.concatenate([xt, xd], axis=0)                               # (B*(Nt+Nd), D_IN)
    w_ec = jnp.concatenate([params["w_enc"], params["w_cur"]], axis=1)      # (D_IN, 2*D_MODEL)
    b_ec = jnp.concatenate([params["b_enc"], params["b_cur"]],
                           axis=0).reshape(1, 2 * D_MODEL)                  # (1, 2*D_MODEL)
    tmask = temp_token_mask.astype(jnp.float32).reshape(Bb, Nt, 1)
    cmask = current_track_mask.astype(jnp.float32).reshape(Bb, 1, Nd)
    valid = tmask * cmask                                                   # (B, Nt, Nd)
    tgt = targets.astype(jnp.float32)

    vmem = pl.BlockSpec(memory_space=pltpu.MemorySpace.VMEM)
    enc_flat, cur_flat, tp_flat, conf_matrix, losses = pl.pallas_call(
        _std_loss_kernel,
        out_shape=(
            jax.ShapeDtypeStruct((Bb * Nt, D_MODEL), jnp.float32),   # track_enc_emb (flat)
            jax.ShapeDtypeStruct((Bb * Nd, D_MODEL), jnp.float32),   # current_track_emb (flat)
            jax.ShapeDtypeStruct((Bb * Nt, TP_DIM), jnp.float32),    # tp (flat)
            jax.ShapeDtypeStruct((Bb, Nt, Nd), jnp.float32),         # conf_matrix
            jax.ShapeDtypeStruct((3, 128), jnp.float32),             # [total, task, nce] rows
        ),
        in_specs=[vmem] * 7,
        out_specs=(vmem, vmem, vmem, vmem, vmem),
    )(x_all, w_ec, b_ec, params["w_tp"], params["b_tp"].reshape(1, TP_DIM), tgt, valid)

    track_enc_emb = enc_flat.reshape(Bb, Nt, D_MODEL)
    current_track_emb = cur_flat.reshape(Bb, Nd, D_MODEL)
    tp = tp_flat.reshape(Bb, Nt, TP_DIM)

    total_loss = losses[0, 0]
    loss_task = losses[1, 0]
    loss_social_nce_track = losses[2, 0]

    outputs = (conf_matrix, tp, track_enc_emb, current_track_emb,
               temp_token_mask, current_track_mask)
    return total_loss, loss_task, loss_social_nce_track, outputs


# ---------------- main ----------------
if __name__ == "__main__":
    key = jax.random.PRNGKey(0)
    k1, k2 = jax.random.split(key)

    # inputs (synthetic): temporal track tokens + current-frame detection tokens
    track_tokens = jax.random.normal(k1, (B, N_TRACK, D_IN), jnp.float32)
    det_tokens = jax.random.normal(k2, (B, N_DET, D_IN), jnp.float32)

    # validity masks (first 14 tracks / 13 detections valid)
    temp_token_mask = jnp.broadcast_to(
        (jnp.arange(N_TRACK) < 14), (B, N_TRACK)).astype(jnp.float32)
    current_track_mask = jnp.broadcast_to(
        (jnp.arange(N_DET) < 13), (B, N_DET)).astype(jnp.float32)

    # targets: GT assignment matrix, track i -> det (i + b) % N_DET for i < 12
    match_idx = (jnp.arange(N_TRACK)[None, :] + jnp.arange(B)[:, None]) % N_DET
    gt_rows = (jnp.arange(N_TRACK) < 12).astype(jnp.float32)[None, :, None]
    targets = jax.nn.one_hot(match_idx, N_DET, dtype=jnp.float32) * gt_rows

    params = init_params()
    forward = jax.jit(std_with_loss_forward)
    total_loss, loss_task, loss_nce, outputs = forward(
        params, track_tokens, det_tokens, temp_token_mask, current_track_mask, targets)

    jax.block_until_ready(total_loss)
    jax.block_until_ready(outputs[0])

    assert jnp.isfinite(total_loss)
    assert outputs[0].shape == (B, N_TRACK, N_DET)
    assert outputs[1].shape == (B, N_TRACK, TP_DIM)
    print("KERNEL_OK")
</pallas_src>

<mosaic_0001>
module attributes {stable_mosaic.version = 11 : i64} {
  func.func @_std_loss_kernel(%arg0: memref<64x32xf32, #tpu.memory_space<vmem>>, %arg1: memref<32x64xf32, #tpu.memory_space<vmem>>, %arg2: memref<1x64xf32, #tpu.memory_space<vmem>>, %arg3: memref<32x4xf32, #tpu.memory_space<vmem>>, %arg4: memref<1x4xf32, #tpu.memory_space<vmem>>, %arg5: memref<2x16x16xf32, #tpu.memory_space<vmem>>, %arg6: memref<2x16x16xf32, #tpu.memory_space<vmem>>, %arg7: memref<32x32xf32, #tpu.memory_space<vmem>>, %arg8: memref<32x32xf32, #tpu.memory_space<vmem>>, %arg9: memref<32x4xf32, #tpu.memory_space<vmem>>, %arg10: memref<2x16x16xf32, #tpu.memory_space<vmem>>, %arg11: memref<3x128xf32, #tpu.memory_space<vmem>>) attributes {dimension_semantics = [], scalar_prefetch = 0 : i64, scratch_operands = 0 : i64, tpu.core_type = #tpu.core_type<tc>} {
    %c0 = arith.constant 0 : index
    %c0_0 = arith.constant 0 : index
    %0 = vector.load %arg0[%c0, %c0_0] : memref<64x32xf32, #tpu.memory_space<vmem>>, vector<64x32xf32>
    %c0_1 = arith.constant 0 : index
    %c0_2 = arith.constant 0 : index
    %1 = vector.load %arg1[%c0_1, %c0_2] : memref<32x64xf32, #tpu.memory_space<vmem>>, vector<32x64xf32>
    %cst = arith.constant dense<0.000000e+00> : vector<64x64xf32>
    %2 = tpu.matmul %0, %1, %cst {dimension_numbers = #tpu.dot_dimension_numbers<[1], [0], [0], [1], [0, 0, 1, 1], [], []>} : vector<64x32xf32>, vector<32x64xf32>, vector<64x64xf32> -> vector<64x64xf32>
    %c0_3 = arith.constant 0 : index
    %c0_4 = arith.constant 0 : index
    %3 = vector.load %arg2[%c0_3, %c0_4] : memref<1x64xf32, #tpu.memory_space<vmem>>, vector<1x64xf32>
    %4 = vector.broadcast %3 : vector<1x64xf32> to vector<64x64xf32>
    %5 = arith.addf %2, %4 : vector<64x64xf32>
    %6 = vector.extract_strided_slice %5 {offsets = [0, 0], sizes = [32, 32], strides = [1, 1]} : vector<64x64xf32> to vector<32x32xf32>
    %7 = vector.extract_strided_slice %5 {offsets = [32, 32], sizes = [32, 32], strides = [1, 1]} : vector<64x64xf32> to vector<32x32xf32>
    %c0_5 = arith.constant 0 : index
    %c0_6 = arith.constant 0 : index
    %8 = vector.load %arg3[%c0_5, %c0_6] : memref<32x4xf32, #tpu.memory_space<vmem>>, vector<32x4xf32>
    %cst_7 = arith.constant dense<0.000000e+00> : vector<32x4xf32>
    %9 = tpu.matmul %6, %8, %cst_7 {dimension_numbers = #tpu.dot_dimension_numbers<[1], [0], [0], [1], [0, 0, 1, 1], [], []>} : vector<32x32xf32>, vector<32x4xf32>, vector<32x4xf32> -> vector<32x4xf32>
    %c0_8 = arith.constant 0 : index
    %c0_9 = arith.constant 0 : index
    %10 = vector.load %arg4[%c0_8, %c0_9] : memref<1x4xf32, #tpu.memory_space<vmem>>, vector<1x4xf32>
    %11 = vector.broadcast %10 : vector<1x4xf32> to vector<32x4xf32>
    %12 = arith.addf %9, %11 : vector<32x4xf32>
    %c0_10 = arith.constant 0 : index
    %c0_11 = arith.constant 0 : index
    %13 = vector.load %arg7[%c0_10, %c0_11] : memref<32x32xf32, #tpu.memory_space<vmem>>, vector<32x32xf32>
    tpu.vector_store %arg7[%c0_10, %c0_11], %6 {strides = array<i32>} : memref<32x32xf32, #tpu.memory_space<vmem>>, vector<32x32xf32>,
    %c0_12 = arith.constant 0 : index
    %c0_13 = arith.constant 0 : index
    %14 = vector.load %arg8[%c0_12, %c0_13] : memref<32x32xf32, #tpu.memory_space<vmem>>, vector<32x32xf32>
    tpu.vector_store %arg8[%c0_12, %c0_13], %7 {strides = array<i32>} : memref<32x32xf32, #tpu.memory_space<vmem>>, vector<32x32xf32>,
    %c0_14 = arith.constant 0 : index
    %c0_15 = arith.constant 0 : index
    %15 = vector.load %arg9[%c0_14, %c0_15] : memref<32x4xf32, #tpu.memory_space<vmem>>, vector<32x4xf32>
    tpu.vector_store %arg9[%c0_14, %c0_15], %12 {strides = array<i32>} : memref<32x4xf32, #tpu.memory_space<vmem>>, vector<32x4xf32>,
    %16 = arith.mulf %6, %6 : vector<32x32xf32>
    %cst_16 = arith.constant dense<0.000000e+00> : vector<32xf32>
    %17 = vector.multi_reduction <add>, %16, %cst_16 [1] : vector<32x32xf32> to vector<32xf32>
    %18 = vector.shape_cast %17 : vector<32xf32> to vector<32x1xf32>
    %cst_17 = arith.constant 9.99999997E-7 : f32
    %19 = vector.broadcast %cst_17 : f32 to vector<32x1xf32>
    %20 = arith.addf %18, %19 : vector<32x1xf32>
    %21 = math.rsqrt %20 : vector<32x1xf32>
    %cst_18 = arith.constant 1.000000e+00 : f32
    %22 = vector.broadcast %cst_18 : f32 to vector<1x32xf32>
    %23 = arith.mulf %7, %7 : vector<32x32xf32>
    %cst_19 = arith.constant dense<0.000000e+00> : vector<1x32xf32>
    %24 = tpu.matmul %22, %23, %cst_19 {dimension_numbers = #tpu.dot_dimension_numbers<[1], [1], [0], [0], [0, 0, 1, 0], [], []>} : vector<1x32xf32>, vector<32x32xf32>, vector<1x32xf32> -> vector<1x32xf32>
    %cst_20 = arith.constant 9.99999997E-7 : f32
    %25 = vector.broadcast %cst_20 : f32 to vector<1x32xf32>
    %26 = arith.addf %24, %25 : vector<1x32xf32>
    %27 = math.rsqrt %26 : vector<1x32xf32>
    %cst_21 = arith.constant 0.000000e+00 : f32
    %28 = vector.broadcast %cst_21 : f32 to vector<16x16xf32>
    %cst_22 = arith.constant 0.000000e+00 : f32
    %29 = vector.broadcast %cst_22 : f32 to vector<16x16xf32>
    %cst_23 = arith.constant 0.000000e+00 : f32
    %30 = vector.broadcast %cst_23 : f32 to vector<16x1xf32>
    %cst_24 = arith.constant 0.000000e+00 : f32
    %31 = vector.broadcast %cst_24 : f32 to vector<16x1xf32>
    %32 = vector.extract_strided_slice %6 {offsets = [0, 0], sizes = [16, 32], strides = [1, 1]} : vector<32x32xf32> to vector<16x32xf32>
    %33 = vector.extract_strided_slice %7 {offsets = [0, 0], sizes = [16, 32], strides = [1, 1]} : vector<32x32xf32> to vector<16x32xf32>
    %c0_25 = arith.constant 0 : index
    %c0_26 = arith.constant 0 : index
    %c0_27 = arith.constant 0 : index
    %34 = vector.load %arg5[%c0_25, %c0_26, %c0_27] : memref<2x16x16xf32, #tpu.memory_space<vmem>>, vector<1x16x16xf32>
    %35 = vector.shape_cast %34 : vector<1x16x16xf32> to vector<16x16xf32>
    %c0_28 = arith.constant 0 : index
    %c0_29 = arith.constant 0 : index
    %c0_30 = arith.constant 0 : index
    %36 = vector.load %arg6[%c0_28, %c0_29, %c0_30] : memref<2x16x16xf32, #tpu.memory_space<vmem>>, vector<1x16x16xf32>
    %37 = vector.shape_cast %36 : vector<1x16x16xf32> to vector<16x16xf32>
    %cst_31 = arith.constant 0.000000e+00 : f32
    %38 = vector.broadcast %cst_31 : f32 to vector<16x16xf32>
    %39 = arith.cmpf ogt, %37, %38 : vector<16x16xf32>
    %cst_32 = arith.constant dense<0.000000e+00> : vector<16x16xf32>
    %40 = tpu.matmul %32, %33, %cst_32 {dimension_numbers = #tpu.dot_dimension_numbers<[1], [1], [0], [0], [0, 0, 1, 0], [], []>} : vector<16x32xf32>, vector<16x32xf32>, vector<16x16xf32> -> vector<16x16xf32>
    %cst_33 = arith.constant 0.176776692 : f32
    %41 = vector.broadcast %cst_33 : f32 to vector<16x16xf32>
    %42 = arith.mulf %40, %41 : vector<16x16xf32>
    %cst_34 = arith.constant -1.000000e+09 : f32
    %43 = vector.broadcast %cst_34 : f32 to vector<16x16xf32>
    %44 = arith.select %39, %42, %43 : vector<16x16xi1>, vector<16x16xf32>
    %cst_35 = arith.constant dense<0xFF800000> : vector<16xf32>
    %45 = vector.multi_reduction <maximumf>, %44, %cst_35 [1] : vector<16x16xf32> to vector<16xf32>
    %46 = vector.shape_cast %45 : vector<16xf32> to vector<16x1xf32>
    %47 = vector.broadcast %46 : vector<16x1xf32> to vector<16x16xf32>
    %48 = arith.subf %44, %47 : vector<16x16xf32>
    %49 = math.exp %48 : vector<16x16xf32>
    %cst_36 = arith.constant dense<0.000000e+00> : vector<16xf32>
    %50 = vector.multi_reduction <add>, %49, %cst_36 [1] : vector<16x16xf32> to vector<16xf32>
    %51 = vector.shape_cast %50 : vector<16xf32> to vector<16x1xf32>
    %cst_37 = arith.constant 9.99999971E-10 : f32
    %52 = vector.broadcast %cst_37 : f32 to vector<16x1xf32>
    %53 = arith.maximumf %51, %52 : vector<16x1xf32>
    %54 = tpu.reciprocal %53 {approx = true} : vector<16x1xf32> -> vector<16x1xf32>
    %cst_38 = arith.constant dense<0xFF800000> : vector<16xf32>
    %55 = vector.multi_reduction <maximumf>, %44, %cst_38 [0] : vector<16x16xf32> to vector<16xf32>
    %56 = vector.shape_cast %55 : vector<16xf32> to vector<1x16xf32>
    %57 = vector.broadcast %56 : vector<1x16xf32> to vector<16x16xf32>
    %58 = arith.subf %44, %57 : vector<16x16xf32>
    %59 = math.exp %58 : vector<16x16xf32>
    %cst_39 = arith.constant dense<0.000000e+00> : vector<16xf32>
    %60 = vector.multi_reduction <add>, %59, %cst_39 [0] : vector<16x16xf32> to vector<16xf32>
    %61 = vector.shape_cast %60 : vector<16xf32> to vector<1x16xf32>
    %cst_40 = arith.constant 9.99999971E-10 : f32
    %62 = vector.broadcast %cst_40 : f32 to vector<1x16xf32>
    %63 = arith.maximumf %61, %62 : vector<1x16xf32>
    %64 = tpu.reciprocal %63 {approx = true} : vector<1x16xf32> -> vector<1x16xf32>
    %65 = vector.broadcast %54 : vector<16x1xf32> to vector<16x16xf32>
    %66 = arith.mulf %49, %65 : vector<16x16xf32>
    %67 = arith.mulf %66, %59 : vector<16x16xf32>
    %68 = vector.broadcast %64 : vector<1x16xf32> to vector<16x16xf32>
    %69 = arith.mulf %67, %68 : vector<16x16xf32>
    %70 = arith.mulf %69, %37 : vector<16x16xf32>
    %c0_41 = arith.constant 0 : index
    %c0_42 = arith.constant 0 : index
    %c0_43 = arith.constant 0 : index
    %71 = vector.load %arg10[%c0_41, %c0_42, %c0_43] : memref<2x16x16xf32, #tpu.memory_space<vmem>>, vector<1x16x16xf32>
    %72 = vector.shape_cast %71 : vector<1x16x16xf32> to vector<16x16xf32>
    %73 = vector.shape_cast %70 : vector<16x16xf32> to vector<1x16x16xf32>
    tpu.vector_store %arg10[%c0_41, %c0_42, %c0_43], %73 {strides = array<i32>} : memref<2x16x16xf32, #tpu.memory_space<vmem>>, vector<1x16x16xf32>,
    %cst_44 = arith.constant 1.000000e+00 : f32
    %cst_45 = arith.constant 9.99999997E-7 : f32
    %74 = arith.subf %cst_44, %cst_45 : f32
    %cst_46 = arith.constant 9.99999997E-7 : f32
    %75 = vector.broadcast %cst_46 : f32 to vector<16x16xf32>
    %76 = arith.maximumf %75, %70 : vector<16x16xf32>
    %77 = vector.broadcast %74 : f32 to vector<16x16xf32>
    %78 = arith.minimumf %77, %76 : vector<16x16xf32>
    %cst_47 = arith.constant 1.000000e+00 : f32
    %79 = vector.broadcast %cst_47 : f32 to vector<16x16xf32>
    %80 = arith.subf %79, %78 : vector<16x16xf32>
    %81 = arith.mulf %80, %80 : vector<16x16xf32>
    %82 = arith.mulf %35, %81 : vector<16x16xf32>
    %83 = math.log %78 : vector<16x16xf32>
    %84 = arith.mulf %82, %83 : vector<16x16xf32>
    %cst_48 = arith.constant 1.000000e+00 : f32
    %85 = vector.broadcast %cst_48 : f32 to vector<16x16xf32>
    %86 = arith.subf %85, %35 : vector<16x16xf32>
    %87 = arith.mulf %78, %78 : vector<16x16xf32>
    %88 = arith.mulf %86, %87 : vector<16x16xf32>
    %89 = math.log %80 : vector<16x16xf32>
    %90 = arith.mulf %88, %89 : vector<16x16xf32>
    %91 = arith.addf %84, %90 : vector<16x16xf32>
    %cst_49 = arith.constant -2.500000e-01 : f32
    %92 = vector.broadcast %cst_49 : f32 to vector<16x16xf32>
    %93 = arith.mulf %92, %91 : vector<16x16xf32>
    %94 = arith.mulf %93, %37 : vector<16x16xf32>
    %95 = arith.addf %28, %94 : vector<16x16xf32>
    %96 = arith.addf %29, %37 : vector<16x16xf32>
    %97 = vector.extract_strided_slice %21 {offsets = [0, 0], sizes = [16, 1], strides = [1, 1]} : vector<32x1xf32> to vector<16x1xf32>
    %98 = vector.extract_strided_slice %27 {offsets = [0, 0], sizes = [1, 16], strides = [1, 1]} : vector<1x32xf32> to vector<1x16xf32>
    %99 = vector.broadcast %97 : vector<16x1xf32> to vector<16x16xf32>
    %100 = arith.mulf %40, %99 : vector<16x16xf32>
    %101 = vector.broadcast %98 : vector<1x16xf32> to vector<16x16xf32>
    %102 = arith.mulf %100, %101 : vector<16x16xf32>
    %cst_50 = arith.constant 1.000000e+01 : f32
    %103 = vector.broadcast %cst_50 : f32 to vector<16x16xf32>
    %104 = arith.mulf %102, %103 : vector<16x16xf32>
    %cst_51 = arith.constant -1.000000e+09 : f32
    %105 = vector.broadcast %cst_51 : f32 to vector<16x16xf32>
    %106 = arith.select %39, %104, %105 : vector<16x16xi1>, vector<16x16xf32>
    %cst_52 = arith.constant dense<0xFF800000> : vector<16xf32>
    %107 = vector.multi_reduction <maximumf>, %106, %cst_52 [1] : vector<16x16xf32> to vector<16xf32>
    %108 = vector.shape_cast %107 : vector<16xf32> to vector<16x1xf32>
    %109 = vector.broadcast %108 : vector<16x1xf32> to vector<16x16xf32>
    %110 = arith.subf %106, %109 : vector<16x16xf32>
    %111 = math.exp %110 : vector<16x16xf32>
    %cst_53 = arith.constant dense<0.000000e+00> : vector<16xf32>
    %112 = vector.multi_reduction <add>, %111, %cst_53 [1] : vector<16x16xf32> to vector<16xf32>
    %113 = vector.shape_cast %112 : vector<16xf32> to vector<16x1xf32>
    %114 = arith.mulf %111, %35 : vector<16x16xf32>
    %cst_54 = arith.constant dense<0.000000e+00> : vector<16xf32>
    %115 = vector.multi_reduction <add>, %114, %cst_54 [1] : vector<16x16xf32> to vector<16xf32>
    %116 = vector.shape_cast %115 : vector<16xf32> to vector<16x1xf32>
    %117 = arith.mulf %35, %37 : vector<16x16xf32>
    %cst_55 = arith.constant dense<0.000000e+00> : vector<16xf32>
    %118 = vector.multi_reduction <add>, %117, %cst_55 [1] : vector<16x16xf32> to vector<16xf32>
    %119 = vector.shape_cast %118 : vector<16xf32> to vector<16x1xf32>
    %cst_56 = arith.constant 0.000000e+00 : f32
    %120 = vector.broadcast %cst_56 : f32 to vector<16x1xf32>
    %121 = arith.cmpf ogt, %119, %120 : vector<16x1xf32>
    %cst_57 = arith.constant 9.99999971E-10 : f32
    %122 = vector.broadcast %cst_57 : f32 to vector<16x1xf32>
    %123 = arith.maximumf %113, %122 : vector<16x1xf32>
    %124 = math.log %123 : vector<16x1xf32>
    %cst_58 = arith.constant 9.99999971E-10 : f32
    %125 = vector.broadcast %cst_58 : f32 to vector<16x1xf32>
    %126 = arith.maximumf %116, %125 : vector<16x1xf32>
    %127 = math.log %126 : vector<16x1xf32>
    %128 = arith.subf %124, %127 : vector<16x1xf32>
    %cst_59 = arith.constant 0.000000e+00 : f32
    %129 = vector.broadcast %cst_59 : f32 to vector<16x1xf32>
    %130 = arith.select %121, %128, %129 : vector<16x1xi1>, vector<16x1xf32>
    %131 = arith.addf %30, %130 : vector<16x1xf32>
    %132 = arith.extui %121 : vector<16x1xi1> to vector<16x1xi32>
    %133 = arith.sitofp %132 : vector<16x1xi32> to vector<16x1xf32>
    %134 = arith.addf %31, %133 : vector<16x1xf32>
    %135 = vector.extract_strided_slice %6 {offsets = [16, 0], sizes = [16, 32], strides = [1, 1]} : vector<32x32xf32> to vector<16x32xf32>
    %136 = vector.extract_strided_slice %7 {offsets = [16, 0], sizes = [16, 32], strides = [1, 1]} : vector<32x32xf32> to vector<16x32xf32>
    %c1 = arith.constant 1 : index
    %c0_60 = arith.constant 0 : index
    %c0_61 = arith.constant 0 : index
    %137 = vector.load %arg5[%c1, %c0_60, %c0_61] : memref<2x16x16xf32, #tpu.memory_space<vmem>>, vector<1x16x16xf32>
    %138 = vector.shape_cast %137 : vector<1x16x16xf32> to vector<16x16xf32>
    %c1_62 = arith.constant 1 : index
    %c0_63 = arith.constant 0 : index
    %c0_64 = arith.constant 0 : index
    %139 = vector.load %arg6[%c1_62, %c0_63, %c0_64] : memref<2x16x16xf32, #tpu.memory_space<vmem>>, vector<1x16x16xf32>
    %140 = vector.shape_cast %139 : vector<1x16x16xf32> to vector<16x16xf32>
    %cst_65 = arith.constant 0.000000e+00 : f32
    %141 = vector.broadcast %cst_65 : f32 to vector<16x16xf32>
    %142 = arith.cmpf ogt, %140, %141 : vector<16x16xf32>
    %cst_66 = arith.constant dense<0.000000e+00> : vector<16x16xf32>
    %143 = tpu.matmul %135, %136, %cst_66 {dimension_numbers = #tpu.dot_dimension_numbers<[1], [1], [0], [0], [0, 0, 1, 0], [], []>} : vector<16x32xf32>, vector<16x32xf32>, vector<16x16xf32> -> vector<16x16xf32>
    %cst_67 = arith.constant 0.176776692 : f32
    %144 = vector.broadcast %cst_67 : f32 to vector<16x16xf32>
    %145 = arith.mulf %143, %144 : vector<16x16xf32>
    %cst_68 = arith.constant -1.000000e+09 : f32
    %146 = vector.broadcast %cst_68 : f32 to vector<16x16xf32>
    %147 = arith.select %142, %145, %146 : vector<16x16xi1>, vector<16x16xf32>
    %cst_69 = arith.constant dense<0xFF800000> : vector<16xf32>
    %148 = vector.multi_reduction <maximumf>, %147, %cst_69 [1] : vector<16x16xf32> to vector<16xf32>
    %149 = vector.shape_cast %148 : vector<16xf32> to vector<16x1xf32>
    %150 = vector.broadcast %149 : vector<16x1xf32> to vector<16x16xf32>
    %151 = arith.subf %147, %150 : vector<16x16xf32>
    %152 = math.exp %151 : vector<16x16xf32>
    %cst_70 = arith.constant dense<0.000000e+00> : vector<16xf32>
    %153 = vector.multi_reduction <add>, %152, %cst_70 [1] : vector<16x16xf32> to vector<16xf32>
    %154 = vector.shape_cast %153 : vector<16xf32> to vector<16x1xf32>
    %cst_71 = arith.constant 9.99999971E-10 : f32
    %155 = vector.broadcast %cst_71 : f32 to vector<16x1xf32>
    %156 = arith.maximumf %154, %155 : vector<16x1xf32>
    %157 = tpu.reciprocal %156 {approx = true} : vector<16x1xf32> -> vector<16x1xf32>
    %cst_72 = arith.constant dense<0xFF800000> : vector<16xf32>
    %158 = vector.multi_reduction <maximumf>, %147, %cst_72 [0] : vector<16x16xf32> to vector<16xf32>
    %159 = vector.shape_cast %158 : vector<16xf32> to vector<1x16xf32>
    %160 = vector.broadcast %159 : vector<1x16xf32> to vector<16x16xf32>
    %161 = arith.subf %147, %160 : vector<16x16xf32>
    %162 = math.exp %161 : vector<16x16xf32>
    %cst_73 = arith.constant dense<0.000000e+00> : vector<16xf32>
    %163 = vector.multi_reduction <add>, %162, %cst_73 [0] : vector<16x16xf32> to vector<16xf32>
    %164 = vector.shape_cast %163 : vector<16xf32> to vector<1x16xf32>
    %cst_74 = arith.constant 9.99999971E-10 : f32
    %165 = vector.broadcast %cst_74 : f32 to vector<1x16xf32>
    %166 = arith.maximumf %164, %165 : vector<1x16xf32>
    %167 = tpu.reciprocal %166 {approx = true} : vector<1x16xf32> -> vector<1x16xf32>
    %168 = vector.broadcast %157 : vector<16x1xf32> to vector<16x16xf32>
    %169 = arith.mulf %152, %168 : vector<16x16xf32>
    %170 = arith.mulf %169, %162 : vector<16x16xf32>
    %171 = vector.broadcast %167 : vector<1x16xf32> to vector<16x16xf32>
    %172 = arith.mulf %170, %171 : vector<16x16xf32>
    %173 = arith.mulf %172, %140 : vector<16x16xf32>
    %c1_75 = arith.constant 1 : index
    %c0_76 = arith.constant 0 : index
    %c0_77 = arith.constant 0 : index
    %174 = vector.load %arg10[%c1_75, %c0_76, %c0_77] : memref<2x16x16xf32, #tpu.memory_space<vmem>>, vector<1x16x16xf32>
    %175 = vector.shape_cast %174 : vector<1x16x16xf32> to vector<16x16xf32>
    %176 = vector.shape_cast %173 : vector<16x16xf32> to vector<1x16x16xf32>
    tpu.vector_store %arg10[%c1_75, %c0_76, %c0_77], %176 {strides = array<i32>} : memref<2x16x16xf32, #tpu.memory_space<vmem>>, vector<1x16x16xf32>,
    %cst_78 = arith.constant 1.000000e+00 : f32
    %cst_79 = arith.constant 9.99999997E-7 : f32
    %177 = arith.subf %cst_78, %cst_79 : f32
    %cst_80 = arith.constant 9.99999997E-7 : f32
    %178 = vector.broadcast %cst_80 : f32 to vector<16x16xf32>
    %179 = arith.maximumf %178, %173 : vector<16x16xf32>
    %180 = vector.broadcast %177 : f32 to vector<16x16xf32>
    %181 = arith.minimumf %180, %179 : vector<16x16xf32>
    %cst_81 = arith.constant 1.000000e+00 : f32
    %182 = vector.broadcast %cst_81 : f32 to vector<16x16xf32>
    %183 = arith.subf %182, %181 : vector<16x16xf32>
    %184 = arith.mulf %183, %183 : vector<16x16xf32>
    %185 = arith.mulf %138, %184 : vector<16x16xf32>
    %186 = math.log %181 : vector<16x16xf32>
    %187 = arith.mulf %185, %186 : vector<16x16xf32>
    %cst_82 = arith.constant 1.000000e+00 : f32
    %188 = vector.broadcast %cst_82 : f32 to vector<16x16xf32>
    %189 = arith.subf %188, %138 : vector<16x16xf32>
    %190 = arith.mulf %181, %181 : vector<16x16xf32>
    %191 = arith.mulf %189, %190 : vector<16x16xf32>
    %192 = math.log %183 : vector<16x16xf32>
    %193 = arith.mulf %191, %192 : vector<16x16xf32>
    %194 = arith.addf %187, %193 : vector<16x16xf32>
    %cst_83 = arith.constant -2.500000e-01 : f32
    %195 = vector.broadcast %cst_83 : f32 to vector<16x16xf32>
    %196 = arith.mulf %195, %194 : vector<16x16xf32>
    %197 = arith.mulf %196, %140 : vector<16x16xf32>
    %198 = arith.addf %95, %197 : vector<16x16xf32>
    %199 = arith.addf %96, %140 : vector<16x16xf32>
    %200 = vector.extract_strided_slice %21 {offsets = [16, 0], sizes = [16, 1], strides = [1, 1]} : vector<32x1xf32> to vector<16x1xf32>
    %201 = vector.extract_strided_slice %27 {offsets = [0, 16], sizes = [1, 16], strides = [1, 1]} : vector<1x32xf32> to vector<1x16xf32>
    %202 = vector.broadcast %200 : vector<16x1xf32> to vector<16x16xf32>
    %203 = arith.mulf %143, %202 : vector<16x16xf32>
    %204 = vector.broadcast %201 : vector<1x16xf32> to vector<16x16xf32>
    %205 = arith.mulf %203, %204 : vector<16x16xf32>
    %cst_84 = arith.constant 1.000000e+01 : f32
    %206 = vector.broadcast %cst_84 : f32 to vector<16x16xf32>
    %207 = arith.mulf %205, %206 : vector<16x16xf32>
    %cst_85 = arith.constant -1.000000e+09 : f32
    %208 = vector.broadcast %cst_85 : f32 to vector<16x16xf32>
    %209 = arith.select %142, %207, %208 : vector<16x16xi1>, vector<16x16xf32>
    %cst_86 = arith.constant dense<0xFF800000> : vector<16xf32>
    %210 = vector.multi_reduction <maximumf>, %209, %cst_86 [1] : vector<16x16xf32> to vector<16xf32>
    %211 = vector.shape_cast %210 : vector<16xf32> to vector<16x1xf32>
    %212 = vector.broadcast %211 : vector<16x1xf32> to vector<16x16xf32>
    %213 = arith.subf %209, %212 : vector<16x16xf32>
    %214 = math.exp %213 : vector<16x16xf32>
    %cst_87 = arith.constant dense<0.000000e+00> : vector<16xf32>
    %215 = vector.multi_reduction <add>, %214, %cst_87 [1] : vector<16x16xf32> to vector<16xf32>
    %216 = vector.shape_cast %215 : vector<16xf32> to vector<16x1xf32>
    %217 = arith.mulf %214, %138 : vector<16x16xf32>
    %cst_88 = arith.constant dense<0.000000e+00> : vector<16xf32>
    %218 = vector.multi_reduction <add>, %217, %cst_88 [1] : vector<16x16xf32> to vector<16xf32>
    %219 = vector.shape_cast %218 : vector<16xf32> to vector<16x1xf32>
    %220 = arith.mulf %138, %140 : vector<16x16xf32>
    %cst_89 = arith.constant dense<0.000000e+00> : vector<16xf32>
    %221 = vector.multi_reduction <add>, %220, %cst_89 [1] : vector<16x16xf32> to vector<16xf32>
    %222 = vector.shape_cast %221 : vector<16xf32> to vector<16x1xf32>
    %cst_90 = arith.constant 0.000000e+00 : f32
    %223 = vector.broadcast %cst_90 : f32 to vector<16x1xf32>
    %224 = arith.cmpf ogt, %222, %223 : vector<16x1xf32>
    %cst_91 = arith.constant 9.99999971E-10 : f32
    %225 = vector.broadcast %cst_91 : f32 to vector<16x1xf32>
    %226 = arith.maximumf %216, %225 : vector<16x1xf32>
    %227 = math.log %226 : vector<16x1xf32>
    %cst_92 = arith.constant 9.99999971E-10 : f32
    %228 = vector.broadcast %cst_92 : f32 to vector<16x1xf32>
    %229 = arith.maximumf %219, %228 : vector<16x1xf32>
    %230 = math.log %229 : vector<16x1xf32>
    %231 = arith.subf %227, %230 : vector<16x1xf32>
    %cst_93 = arith.constant 0.000000e+00 : f32
    %232 = vector.broadcast %cst_93 : f32 to vector<16x1xf32>
    %233 = arith.select %224, %231, %232 : vector<16x1xi1>, vector<16x1xf32>
    %234 = arith.addf %131, %233 : vector<16x1xf32>
    %235 = arith.extui %224 : vector<16x1xi1> to vector<16x1xi32>
    %236 = arith.sitofp %235 : vector<16x1xi32> to vector<16x1xf32>
    %237 = arith.addf %134, %236 : vector<16x1xf32>
    %cst_94 = arith.constant dense<0.000000e+00> : vector<16xf32>
    %238 = vector.multi_reduction <add>, %198, %cst_94 [1] : vector<16x16xf32> to vector<16xf32>
    %239 = vector.shape_cast %238 : vector<16xf32> to vector<16x1xf32>
    %cst_95 = arith.constant dense<0.000000e+00> : vector<1xf32>
    %240 = vector.multi_reduction <add>, %239, %cst_95 [0] : vector<16x1xf32> to vector<1xf32>
    %241 = vector.shape_cast %240 : vector<1xf32> to vector<1x1xf32>
    %cst_96 = arith.constant dense<0.000000e+00> : vector<16xf32>
    %242 = vector.multi_reduction <add>, %199, %cst_96 [1] : vector<16x16xf32> to vector<16xf32>
    %243 = vector.shape_cast %242 : vector<16xf32> to vector<16x1xf32>
    %cst_97 = arith.constant dense<0.000000e+00> : vector<1xf32>
    %244 = vector.multi_reduction <add>, %243, %cst_97 [0] : vector<16x1xf32> to vector<1xf32>
    %245 = vector.shape_cast %244 : vector<1xf32> to vector<1x1xf32>
    %cst_98 = arith.constant dense<0.000000e+00> : vector<1xf32>
    %246 = vector.multi_reduction <add>, %234, %cst_98 [0] : vector<16x1xf32> to vector<1xf32>
    %247 = vector.shape_cast %246 : vector<1xf32> to vector<1x1xf32>
    %cst_99 = arith.constant dense<0.000000e+00> : vector<1xf32>
    %248 = vector.multi_reduction <add>, %237, %cst_99 [0] : vector<16x1xf32> to vector<1xf32>
    %249 = vector.shape_cast %248 : vector<1xf32> to vector<1x1xf32>
    %cst_100 = arith.constant 1.000000e+00 : f32
    %250 = vector.broadcast %cst_100 : f32 to vector<1x1xf32>
    %251 = arith.maximumf %245, %250 : vector<1x1xf32>
    %252 = arith.divf %241, %251 : vector<1x1xf32>
    %cst_101 = arith.constant 1.000000e+00 : f32
    %253 = vector.broadcast %cst_101 : f32 to vector<1x1xf32>
    %254 = arith.maximumf %249, %253 : vector<1x1xf32>
    %255 = arith.divf %247, %254 : vector<1x1xf32>
    %cst_102 = arith.constant 1.000000e-01 : f32
    %256 = vector.broadcast %cst_102 : f32 to vector<1x1xf32>
    %257 = arith.mulf %256, %255 : vector<1x1xf32>
    %258 = arith.addf %252, %257 : vector<1x1xf32>
    %cst_103 = arith.constant 0.000000e+00 : f32
    %259 = vector.broadcast %cst_103 : f32 to vector<1x128xf32>
    %260 = vector.broadcast %258 : vector<1x1xf32> to vector<1x128xf32>
    %261 = arith.addf %259, %260 : vector<1x128xf32>
    %262 = vector.broadcast %252 : vector<1x1xf32> to vector<1x128xf32>
    %263 = arith.addf %259, %262 : vector<1x128xf32>
    %264 = vector.broadcast %255 : vector<1x1xf32> to vector<1x128xf32>
    %265 = arith.addf %259, %264 : vector<1x128xf32>
    %266 = tpu.concatenate %261, %263, %265 in 0 : vector<1x128xf32>, vector<1x128xf32>, vector<1x128xf32> -> vector<3x128xf32>
    %c0_104 = arith.constant 0 : index
    %c0_105 = arith.constant 0 : index
    %267 = vector.load %arg11[%c0_104, %c0_105] : memref<3x128xf32, #tpu.memory_space<vmem>>, vector<3x128xf32>
    tpu.vector_store %arg11[%c0_104, %c0_105], %266 {strides = array<i32>} : memref<3x128xf32, #tpu.memory_space<vmem>>, vector<3x128xf32>,
    return
  }
}

</mosaic_0001>

<bundles_post_ra>
// kernel: std_with_loss_forward.1
= control target key start
LH: loop header
LB: loop body
LE: loop exit
PB: predicated region body
PF: predicated region fallthrough
CT: control target
= control target key end

     0   :  { %17 = vsyncpa [#allocation3], 0  ;;  %vm52_vm0 = vcmask 261120   ;;  %s1880_s0 = inlined_call_operand.vmem [shape: f32[64,32], index: 0, kind: input, shape index: {}]   ;;  %s1881_s1 = inlined_call_operand.vmem [shape: f32[32,64], index: 1, kind: input, shape index: {}]   ;;  %s1882_s2 = inlined_call_operand.vmem [shape: f32[1,64], index: 2, kind: input, shape index: {}]   ;;  %s1883_s3 = inlined_call_operand.vmem [shape: f32[32,4], index: 3, kind: input, shape index: {}]   ;;  %s1884_s4 = inlined_call_operand.vmem [shape: f32[1,4], index: 4, kind: input, shape index: {}]   ;;  %s1885_s5 = inlined_call_operand.vmem [shape: f32[2,16,16], index: 5, kind: input, shape index: {}]   ;;  %s1886_s6 = inlined_call_operand.vmem [shape: f32[2,16,16], index: 6, kind: input, shape index: {}]   ;;  %s1887_s7 = inlined_call_operand.hbm [shape: f32[32,32], index: 7, kind: output, shape index: {0}]   ;;  %s1888_s8 = inlined_call_operand.hbm [shape: f32[32,32], index: 8, kind: output, shape index: {1}]   ;;  %s1889_s9 = inlined_call_operand.vmem [shape: f32[32,4], index: 9, kind: output, shape index: {2}]   ;;  %s1890_s10 = inlined_call_operand.hbm [shape: f32[2,16,16], index: 10, kind: output, shape index: {3}]   ;;  %s1891_s11 = inlined_call_operand.vmem [shape: f32[3,128], index: 11, kind: output, shape index: {4}]  }
   0x1   :  { %v41_v0 = vld [vmem:[%s1881_s1] sm:$0xff]  ;;  %v42_v1 = vld [vmem:[%s1881_s1 + $0x8] sm:$0xff]  ;;  %v43_v2 = vld [vmem:[%s1881_s1 + $0x10] sm:$0xff] }
   0x2   :  { %v1193_v3 = vpack.c.bf16 %v42_v1, %v41_v0  ;;  %v44_v4 = vld [vmem:[%s1881_s1 + $0x18] sm:$0xff]  ;;  %v33_v5 = vld [vmem:[%s1880_s0] sm:$0xff]  ;;  %v183_v8 = vld [vmem:[%s1883_s3 + $0x8] sm:$0xff] }
   0x3   :  { %v1197_v6 = vpack.c.bf16 %v44_v4, %v43_v2  ;;  %1142 = vmatprep.mubr.msk.f32.mxu0 %vm52_vm0, %v33_v5  ;;  %v182_v7 = vld [vmem:[%s1883_s3] sm:$0xff] }
   0x4   :  { %1194 = vmatprep.subr.bf16.mxu0 %v1193_v3 }
   0x5   :  { %1196 = vmatpush3.bf16.msra.mxu0 %v1193_v3 }
   0x6   :  { %18 = vsyncpa [#allocation5], 0  ;;  %1198 = vmatprep.subr.bf16.mxu0 %v1197_v6  ;;  %v1201_v9 = vpack.c.bf16 %v183_v8, %v182_v7  ;;  %v34_v10 = vld [vmem:[%s1880_s0 + $0x8] sm:$0xff]  ;;  %v35_v11 = vld [vmem:[%s1880_s0 + $0x10] sm:$0xff]  ;;  %v1402_v33 = vmov 0.0|0.0   ;;  %vm1404_vm1 = vmmov 0  }
   0x7   :  { %v36_v12 = vld [vmem:[%s1880_s0 + $0x18] sm:$0xff]  ;;  %v37_v13 = vld [vmem:[%s1880_s0 + $0x20] sm:$0xff]  ;;  %v38_v14 = vld [vmem:[%s1880_s0 + $0x28] sm:$0xff]  ;;  %v1405_v44 = vmov 0.0   ;;  %v1406_v62 = vmov 1.0   ;;  %vm314_vm3 = vcmask 31744  }
   0x8   :  { %1202 = vmatprep.subr.bf16.mxu1 %v1201_v9  ;;  %v39_v15 = vld [vmem:[%s1880_s0 + $0x30] sm:$0xff]  ;;  %v40_v16 = vld [vmem:[%s1880_s0 + $0x38] sm:$0xff]  ;;  %v1066_v20 = vld [vmem:[%s1882_s2] ss:$0 sm:$0xff]  ;;  %s1403_s0 = smov 96   ;;  %vm530_vm5 = vcmask 130048  }
   0x9   :  { %1200 = vmatpush3.bf16.msra.mxu0 %v1197_v6  ;;  %1204 = vmatpush3.bf16.msra.mxu1 %v1201_v9  ;;  %v184_v17 = vld [vmem:[%s1883_s3 + $0x10] sm:$0xff]  ;;  %v185_v18 = vld [vmem:[%s1883_s3 + $0x18] sm:$0xff]  ;;  %vm1558_vm2 = vmpackc.low %vm52_vm0, %vm52_vm0  ;;  %s1409_s1 = smov [#allocation2]  }
   0xa   :  { %v1205_v19 = vpack.c.bf16 %v185_v18, %v184_v17  ;;  %1209 = vmatprep.subr.bf16.mxu0 %v1402_v33  ;;  %v1075_v63 = vld [vmem:[%s1884_s4] ss:$0 sm:$0xff]  ;;  %v1602_v8 = vld [vmem:[%s1886_s6 + $0x8] sm:$0xff]  ;;  %s1016_s12 = sshll.u32 %s1409_s1, 4  ;;  %s1017_s12 = int_to_ptr.vmem [resolvable:$true] %s1016_s12 }
   0xb   :  { %v1607_v9 = vld [vmem:[%s1886_s6] sm:$0xff]  ;;  %vm446_vm4 = vcmp.gt.f32.partialorder %v1602_v8, 0.0 }
   0xc   :  { %1143 = vmatmul.mubr.msk.f32.vlgmr.msra.gmra.mrb[0].mxu0 %vm52_vm0, %v34_v10  ;;  %1206 = vmatprep.subr.bf16.mxu1 %v1205_v19  ;;  %vm445_vm6 = vcmp.gt.f32.partialorder %v1607_v9, 0.0 }
   0xd   :  { %1145 = vmatprep.mubr.msk.f32.mxu0 %vm52_vm0, %v35_v11  ;;  %1208 = vmatpush3.bf16.msra.mxu1 %v1205_v19  ;;  %v1631_v19 = vld [vmem:[%s1886_s6 + $0x18] sm:$0xff] }
   0xe   :  { %vm704_vm7 = vcmp.gt.f32.partialorder %v1631_v19, 0.0 }
  0x10   :  { %1146 = vmatmul.mubr.msk.f32.gmra.mrb[2].mxu0 %vm52_vm0, %v36_v12 }
  0x11   :  { %1148 = vmatprep.mubr.msk.f32.mxu0 %vm52_vm0, %v37_v13 }
  0x14   :  { %1149 = vmatmul.mubr.msk.f32.gmra.mrb[4].mxu0 %vm52_vm0, %v38_v14 }
  0x15   :  { %1151 = vmatprep.mubr.msk.f32.mxu0 %vm52_vm0, %v39_v15 }
  0x18   :  { %1152 = vmatmul.mubr.msk.f32.gmra.mrb[6].mxu0 %vm52_vm0, %v40_v16 }
  0x19   :  { %1176 = vmatprep.mubr.msk.f32.mxu0 %vm1404_vm1, %v1405_v44 }
  0xdf   :  { %v1144_v21 = vpop.f32.mrb[0].mxu0 }
  0xe0   :  { %v1532_v22 = vadd.f32 %v1144_v21, %v1066_v20  ;;  %v143_v23 = vpop.f32.mrb[1].mxu0  ;;  %v1638_v21 = vld [vmem:[%s1886_s6 + $0x10] sm:$0xff]  ;;  %s1407_s6 = smov 112  }
  0xe1   :  { %v144_v24 = vadd.f32 %v1066_v20, %v143_v23  ;;  %vm703_vm8 = vcmp.gt.f32.partialorder %v1638_v21, 0.0 }
  0xe2   :  { %291 = vst.msk [vmem:[#allocation2 + $0x8] sm:$0xff] %vm52_vm0, %v1532_v22 }
  0xe3   :  { %290 = vst.msk [vmem:[#allocation2] sm:$0xff] %vm52_vm0, %v144_v24  ;;  %v1147_v25 = vpop.f32.mrb[2].mxu0  ;;  %1162 = vmatprep.mubr.msk.f32.mxu1 %vm52_vm0, %v144_v24  ;;  %v319_v45 = vmul.f32 %v144_v24, %v144_v24 }
  0xe4   :  { %v1538_v26 = vadd.f32 %v1147_v25, %v1066_v20  ;;  %v153_v27 = vpop.f32.mrb[3].mxu0  ;;  %1163 = vmatmul.mubr.msk.f32.vlgmr.msra.gmra.mrb[0].mxu1 %vm52_vm0, %v1532_v22 }
  0xe5   :  { %v1542_v28 = vadd.f32 %v1066_v20, %v153_v27  ;;  %v323_v46 = vsel %vm52_vm0, %v319_v45, 0.0 }
  0xe6   :  { %293 = vst.msk [vmem:[#allocation2 + $0x18] sm:$0xff] %vm52_vm0, %v1538_v26 }
  0xe7   :  { %292 = vst.msk [vmem:[#allocation2 + $0x10] sm:$0xff] %vm52_vm0, %v1542_v28  ;;  %v1150_v29 = vpop.f32.mrb[4].mxu0  ;;  %1165 = vmatprep.mubr.msk.f32.mxu1 %vm52_vm0, %v1542_v28  ;;  %v321_v17 = vmul.f32 %v1542_v28, %v1542_v28 }
  0xe8   :  { %v169_v30 = vadd.f32 %v1150_v29, %v1066_v20  ;;  %v163_v31 = vpop.f32.mrb[5].mxu0  ;;  %1166 = vmatmul.mubr.msk.f32.gmra.mrb[2].mxu1 %vm52_vm0, %v1538_v26 }
  0xe9   :  { %v164_v32 = vadd.f32 %v1066_v20, %v163_v31  ;;  %1183 = vmatprep.mubr.msk.f32.mxu1 %vm52_vm0, %v144_v24  ;;  %v329_v24 = vsel %vm52_vm0, %v321_v17, 0.0 }
  0xea   :  { %v344_v34 = vmul.f32 %v169_v30, %v169_v30 }
  0xeb   :  { %v343_v35 = vmul.f32 %v164_v32, %v164_v32  ;;  %v1153_v36 = vpop.f32.mrb[6].mxu0  ;;  %298 = vrot.lane.b32.xlu0 %v164_v32, %s1403_s0 }
  0xec   :  { %v179_v37 = vadd.f32 %v1153_v36, %v1066_v20  ;;  %v173_v38 = vpop.f32.mrb[7].mxu0 }
  0xed   :  { %v174_v39 = vadd.f32 %v1066_v20, %v173_v38  ;;  %v1240_v40 = vpack.i.bf16 %v344_v34, %v343_v35  ;;  %v320_v38 = vmul.f32 %v1532_v22, %v1532_v22 }
  0xee   :  { %v346_v41 = vmul.f32 %v179_v37, %v179_v37 }
  0xef   :  { %v345_v42 = vmul.f32 %v174_v39, %v174_v39  ;;  %302 = vrot.lane.b32.xlu1 %v174_v39, %s1403_s0  ;;  %300 = vrot.lane.b32.xlu0 %v169_v30, %s1403_s0 }
  0xf1   :  { %v1245_v43 = vpack.i.bf16 %v346_v41, %v345_v42  ;;  %v322_v41 = vmul.f32 %v1538_v26, %v1538_v26 }
  0xf3   :  { %304 = vrot.lane.b32.xlu1 %v179_v37, %s1403_s0  ;;  %1241 = vrot.lane.b32.xlu0 %v1240_v40, %s1403_s0  ;;  %v627_v37 = vlaneseq  ;;  %v326_v40 = vsel %vm52_vm0, %v320_v38, 0.0 }
  0xf5   :  { %v628_v39 = vshrl.u32 %v627_v37, 7 }
  0xf7   :  { %1246 = vrot.lane.b32.xlu1 %v1245_v43, %s1403_s0  ;;  %v629_v42 = vsub.s32 0, %v628_v39  ;;  %v332_v43 = vsel %vm52_vm0, %v322_v41, 0.0 }
 0x11b   :  { %324 = vadd.xlane.f32.xlu1 %v323_v46 }
 0x15d   :  { %v299_v47 = vpop.permute.xlu0 %298 }
 0x15e   :  { %310 = vst.msk [vmem:[#allocation4] sm:$0xff] %vm52_vm0, %v299_v47 }
 0x161   :  { %v303_v48 = vpop.permute.xlu1 %302  ;;  %v301_v49 = vpop.permute.xlu0 %300 }
 0x162   :  { %312 = vst.msk [vmem:[#allocation4 + $0x10] sm:$0xff] %vm52_vm0, %v303_v48  ;;  %311 = vst.msk [vmem:[#allocation4 + $0x8] sm:$0xff] %vm52_vm0, %v301_v49  ;;  %v1217_v51 = vpack.c.bf16 %v301_v49, %v299_v47 }
 0x164   :  { %1219 = vmatprep.subr.msk.bf16.mxu1 %vm1558_vm2, %v1217_v51 }
 0x165   :  { %v305_v52 = vpop.permute.xlu1 %304  ;;  %v1242_v53 = vpop.permute.xlu0 %1241  ;;  %1222 = vmatpush3.bf16.xpose.msk.msra.mxu1 %vm1558_vm2, %v1217_v51 }
 0x166   :  { %313 = vst.msk [vmem:[#allocation4 + $0x18] sm:$0xff] %vm52_vm0, %v305_v52  ;;  %v1223_v54 = vpack.c.bf16 %v305_v52, %v303_v48  ;;  %v1244_v55 = vunpack.i.h.bf16 %v1242_v53  ;;  %v1243_v56 = vunpack.i.l.bf16 %v1242_v53 }
 0x168   :  { %v1210_v57 = vpack.c.bf16 %v1244_v55, %v1243_v56  ;;  %1225 = vmatprep.subr.msk.bf16.mxu1 %vm1558_vm2, %v1223_v54 }
 0x169   :  { %v1247_v58 = vpop.permute.xlu1 %1246 }
 0x16a   :  { %1212 = vmatpush3.bf16.xpose.msk.msra.mxu0 %vm1558_vm2, %v1210_v57  ;;  %v1249_v59 = vunpack.i.h.bf16 %v1247_v58  ;;  %v1248_v60 = vunpack.i.l.bf16 %v1247_v58 }
 0x16b   :  { %1213 = vmatprep.subr.bf16.mxu0 %v1402_v33 }
 0x16c   :  { %1184 = vmatmul.mubr.msk.f32.vlgmr.msra.gmra.mrb[4].mxu1 %vm52_vm0, %v1532_v22  ;;  %v1214_v61 = vpack.c.bf16 %v1249_v59, %v1248_v60 }
 0x16d   :  { %1228 = vmatpush3.bf16.xpose.msk.msra.mxu1 %vm1558_vm2, %v1223_v54  ;;  %1190 = vmatprep.mubr.msk.f32.mxu1 %vm52_vm0, %v1542_v28 }
 0x172   :  { %1216 = vmatpush3.bf16.xpose.msk.msra.mxu0 %vm1558_vm2, %v1214_v61 }
 0x174   :  { %1191 = vmatmul.mubr.msk.f32.vlgmr.msra.gmra.mrb[6].mxu1 %vm52_vm0, %v1538_v26 }
 0x179   :  { %1177 = vmatmul.mubr.msk.f32.vlgmr.msra.gmra.mrb[8].mxu0 %vm52_vm0, %v1406_v62 }
 0x1a8   :  { %v325_v47 = vpop.xlane.xlu1 %324 }
 0x1a9   :  { %v335_v48 = vadd.f32 1e-06, %v325_v47 }
 0x1b7   :  { %v1164_v0 = vpop.f32.mrb[0].mxu1 }
 0x1b8   :  { %v277_v1 = vadd.f32 %v1164_v0, %v1075_v63  ;;  %v271_v2 = vpop.f32.mrb[1].mxu1 }
 0x1b9   :  { %v272_v3 = vadd.f32 %v1075_v63, %v271_v2 }
 0x1ba   :  { %316 = vst.msk [vmem:[%s1889_s9 + $0x8] sm:$0xff] %vm314_vm3, %v277_v1 }
 0x1bb   :  { %315 = vst.msk [vmem:[%s1889_s9] sm:$0xff] %vm314_vm3, %v272_v3  ;;  %v1167_v4 = vpop.f32.mrb[2].mxu1 }
 0x1bc   :  { %v287_v5 = vadd.f32 %v1167_v4, %v1075_v63  ;;  %v281_v6 = vpop.f32.mrb[3].mxu1 }
 0x1bd   :  { %v282_v7 = vadd.f32 %v1075_v63, %v281_v6 }
 0x1be   :  { %318 = vst.msk [vmem:[%s1889_s9 + $0x18] sm:$0xff] %vm314_vm3, %v287_v5 }
 0x1bf   :  { %317 = vst.msk [vmem:[%s1889_s9 + $0x10] sm:$0xff] %vm314_vm3, %v282_v7 }
 0x23f   :  { %v1609_v10 = vpop.f32.mrb[4].mxu1 }
 0x240   :  { %v527_v11 = vmul.f32 0.17677669, %v1609_v10  ;;  %v517_v12 = vpop.f32.mrb[5].mxu1 }
 0x241   :  { %v526_v13 = vmul.f32 0.17677669, %v517_v12 }
 0x242   :  { %v1616_v14 = vsel %vm446_vm4, %v527_v11, -1e+09 }
 0x243   :  { %v534_v15 = vsel %vm530_vm5, %v1616_v14, -inf  ;;  %v1622_v16 = vsel %vm445_vm6, %v526_v13, -1e+09 }
 0x244   :  { %535 = vmax.xlane.f32.xlu1 %v534_v15  ;;  %v531_v18 = vsel %vm530_vm5, %v1622_v16, -inf }
 0x245   :  { %532 = vmax.xlane.f32.xlu0 %v531_v18  ;;  %v1633_v20 = vmax.f32 %v531_v18, %v534_v15 }
 0x247   :  { %v1640_v23 = vpop.f32.mrb[6].mxu1 }
 0x248   :  { %v785_v25 = vmul.f32 0.17677669, %v1640_v23  ;;  %330 = vadd.xlane.f32.xlu1 %v329_v24  ;;  %v1646_v27 = vpop.f32.mrb[7].mxu1 }
 0x249   :  { %v784_v28 = vmul.f32 0.17677669, %v1646_v27 }
 0x24a   :  { %v1651_v29 = vsel %vm704_vm7, %v785_v25, -1e+09 }
 0x24b   :  { %v1655_v30 = vsel %vm703_vm8, %v784_v28, -1e+09  ;;  %v791_v31 = vsel %vm530_vm5, %v1651_v29, -inf }
 0x24c   :  { %v436_v32 = vpop.f32.mrb[8].mxu0  ;;  %792 = vmax.xlane.f32.xlu0 %v791_v31  ;;  %v788_v33 = vsel %vm530_vm5, %v1655_v30, -inf }
 0x24d   :  { %v437_v34 = vadd.f32 1e-06, %v436_v32  ;;  %v1661_v35 = vmax.f32 %v788_v33, %v791_v31  ;;  %v1178_v36 = vpop.f32.mrb[9].mxu0 }
 0x24f   :  { %1250 = vrsqrt.f32 %v437_v34 }
 0x250   :  { %789 = vmax.xlane.f32.xlu0 %v788_v33  ;;  %1252 = vrsqrt.f32 %v335_v48 }
 0x254   :  { %327 = vadd.xlane.f32.xlu0 %v326_v40 }
 0x258   :  { %333 = vadd.xlane.f32.xlu0 %v332_v43 }
 0x259   :  { %v1251_v45 = vpop.eup %1250 }
 0x25a   :  { %v630_v46 = vrot.slane %v1251_v45, %v629_v42  ;;  %v1253_v22 = vpop.eup %1252  ;;  %v1711_v45 = vld [vmem:[%s1885_s5 + $0x8] sm:$0xff] }
 0x25b   :  { %v625_v49 = vmul.f32 %v1253_v22, %v517_v12  ;;  %v664_v47 = vmul.f32 %v1602_v8, %v1711_v45 }
 0x25c   :  { %886 = vrot.lane.b32.xlu1 %v630_v46, %s1407_s6 }
 0x25d   :  { %v631_v50 = vmul.f32 %v630_v46, %v625_v49  ;;  %v668_v22 = vsel %vm530_vm5, %v664_v47, 0.0 }
 0x25f   :  { %v633_v51 = vmul.f32 10.0, %v631_v50 }
 0x261   :  { %v1671_v52 = vsel %vm445_vm6, %v633_v51, -1e+09 }
 0x262   :  { %v637_v26 = vsel %vm530_vm5, %v1671_v52, -inf }
 0x280   :  { %638 = vmax.xlane.f32.xlu1 %v637_v26  ;;  %v1728_v26 = vld [vmem:[%s1885_s5] sm:$0xff] }
 0x2d1   :  { %v536_v53 = vpop.xlane.xlu1 %535 }
 0x2d2   :  { %v538_v54 = vsub.f32 %v1616_v14, %v536_v53  ;;  %v533_v55 = vpop.xlane.xlu0 %532  ;;  %v663_v53 = vmul.f32 %v1607_v9, %v1728_v26 }
 0x2d3   :  { %v537_v56 = vsub.f32 %v1622_v16, %v533_v55 }
 0x2d4   :  { %v541_v57 = vmul.f32 1.442695, %v538_v54  ;;  %v665_v54 = vsel %vm530_vm5, %v663_v53, 0.0 }
 0x2d5   :  { %v539_v58 = vmul.f32 1.442695, %v537_v56  ;;  %v331_v59 = vpop.xlane.xlu1 %330  ;;  %666 = vadd.xlane.f32.xlu1 %v665_v54 }
 0x2d6   :  { %1254 = vpow2.f32 %v541_v57  ;;  %v337_v60 = vadd.f32 1e-06, %v331_v59  ;;  %v811_v59 = vrot.slane %v1661_v35, 4 }
 0x2d7   :  { %1256 = vpow2.f32 %v539_v58 }
 0x2d8   :  { %1258 = vrsqrt.f32 %v337_v60 }
 0x2d9   :  { %v793_v61 = vpop.xlane.xlu0 %792  ;;  %v887_v28 = vpop.permute.xlu1 %886 }
 0x2da   :  { %v795_v62 = vsub.f32 %v1651_v29, %v793_v61  ;;  %v812_v61 = vmax.f32 %v1661_v35, %v811_v59 }
 0x2dc   :  { %v798_v63 = vmul.f32 1.442695, %v795_v62 }
 0x2dd   :  { %v790_v0 = vpop.xlane.xlu0 %789 }
 0x2de   :  { %1260 = vpow2.f32 %v798_v63  ;;  %v794_v1 = vsub.f32 %v1655_v30, %v790_v0  ;;  %v813_v63 = vrot.slane %v812_v61, 2 }
 0x2e0   :  { %v1679_v2 = vpop.eup %1254  ;;  %v796_v3 = vmul.f32 1.442695, %v794_v1  ;;  %v814_v1 = vmax.f32 %v812_v61, %v813_v63 }
 0x2e1   :  { %v328_v4 = vpop.xlane.xlu0 %327  ;;  %v546_v5 = vsel %vm530_vm5, %v1679_v2, 0.0  ;;  %v1683_v6 = vpop.eup %1256 }
 0x2e2   :  { %1262 = vpow2.f32 %v796_v3  ;;  %v336_v7 = vadd.f32 1e-06, %v328_v4  ;;  %547 = vadd.xlane.f32.xlu0 %v546_v5  ;;  %v543_v12 = vsel %vm530_vm5, %v1683_v6, 0.0  ;;  %v1259_v15 = vpop.eup %1258  ;;  %v815_v4 = vrot.slane %v814_v1, 1 }
 0x2e3   :  { %v883_v24 = vmul.f32 %v1259_v15, %v1646_v27 }
 0x2e4   :  { %1264 = vrsqrt.f32 %v336_v7 }
 0x2e5   :  { %v334_v11 = vpop.xlane.xlu0 %333  ;;  %v889_v33 = vmul.f32 %v887_v28, %v883_v24 }
 0x2e6   :  { %v338_v13 = vadd.f32 1e-06, %v334_v11  ;;  %544 = vadd.xlane.f32.xlu0 %v543_v12  ;;  %v816_v11 = vmax.f32 %v814_v1, %v815_v4 }
 0x2e7   :  { %v891_v38 = vmul.f32 10.0, %v889_v33 }
 0x2e8   :  { %v1687_v17 = vpop.eup %1260  ;;  %1266 = vrsqrt.f32 %v338_v13  ;;  %v818_v13 = vsub.f32 %v1651_v29, %v816_v11 }
 0x2e9   :  { %v803_v18 = vsel %vm530_vm5, %v1687_v17, 0.0  ;;  %v1706_v43 = vsel %vm703_vm8, %v891_v38, -1e+09 }
 0x2ea   :  { %804 = vadd.xlane.f32.xlu0 %v803_v18  ;;  %v821_v35 = vmul.f32 1.442695, %v818_v13 }
 0x2ec   :  { %v1692_v25 = vpop.eup %1262 }
 0x2ed   :  { %v800_v31 = vsel %vm530_vm5, %v1692_v25, 0.0 }
 0x2ee   :  { %v1265_v32 = vpop.eup %1264  ;;  %801 = vadd.xlane.f32.xlu0 %v800_v31 }
 0x2ef   :  { %v626_v34 = vmul.f32 %v1265_v32, %v1609_v10 }
 0x2f1   :  { %v632_v36 = vmul.f32 %v630_v46, %v626_v34 }
 0x2f2   :  { %v1267_v37 = vpop.eup %1266 }
 0x2f3   :  { %v634_v39 = vmul.f32 10.0, %v632_v36  ;;  %v884_v40 = vmul.f32 %v1267_v37, %v1640_v23  ;;  %v895_v23 = vsel %vm530_vm5, %v1706_v43, -inf }
 0x2f5   :  { %v1700_v27 = vsel %vm446_vm4, %v634_v39, -1e+09  ;;  %v890_v41 = vmul.f32 %v887_v28, %v884_v40 }
 0x2f6   :  { %v640_v42 = vsel %vm530_vm5, %v1700_v27, -inf }
 0x2f7   :  { %641 = vmax.xlane.f32.xlu0 %v640_v42  ;;  %v892_v10 = vmul.f32 10.0, %v890_v41 }
 0x2f9   :  { %v1717_v46 = vsel %vm704_vm7, %v892_v10, -1e+09 }
 0x2fa   :  { %v898_v48 = vsel %vm530_vm5, %v1717_v46, -inf }
 0x2fb   :  { %896 = vmax.xlane.f32.xlu0 %v895_v23 }
 0x2ff   :  { %899 = vmax.xlane.f32.xlu0 %v898_v48 }
 0x303   :  { %669 = vadd.xlane.f32.xlu0 %v668_v22 }
 0x30d   :  { %v639_v49 = vpop.xlane.xlu1 %638 }
 0x30e   :  { %v643_v50 = vsub.f32 %v1671_v52, %v639_v49  ;;  %v554_v52 = vrot.slane %v1633_v20, 4 }
 0x310   :  { %v645_v51 = vmul.f32 1.442695, %v643_v50  ;;  %v555_v57 = vmax.f32 %v1633_v20, %v554_v52  ;;  %v817_v20 = vsub.f32 %v1655_v30, %v816_v11 }
 0x312   :  { %1268 = vpow2.f32 %v645_v51  ;;  %v556_v58 = vrot.slane %v555_v57, 2  ;;  %v819_v15 = vmul.f32 1.442695, %v817_v20 }
 0x314   :  { %v557_v60 = vmax.f32 %v555_v57, %v556_v58 }
 0x316   :  { %v558_v62 = vrot.slane %v557_v60, 1 }
 0x318   :  { %v559_v0 = vmax.f32 %v557_v60, %v558_v62 }
 0x31a   :  { %v560_v3 = vsub.f32 %v1622_v16, %v559_v0  ;;  %v561_v5 = vsub.f32 %v1616_v14, %v559_v0 }
 0x31c   :  { %v1733_v55 = vpop.eup %1268  ;;  %v562_v7 = vmul.f32 1.442695, %v560_v3  ;;  %v564_v12 = vmul.f32 1.442695, %v561_v5 }
 0x31d   :  { %v649_v56 = vsel %vm530_vm5, %v1733_v55, 0.0 }
 0x31e   :  { %650 = vadd.xlane.f32.xlu0 %v649_v56  ;;  %1270 = vpow2.f32 %v562_v7 }
 0x31f   :  { %1272 = vpow2.f32 %v564_v12 }
 0x320   :  { %1274 = vpow2.f32 %v819_v15 }
 0x321   :  { %1276 = vpow2.f32 %v821_v35 }
 0x328   :  { %v1271_v18 = vpop.eup %1270 }
 0x329   :  { %v1273_v24 = vpop.eup %1272  ;;  %v566_v16 = vsel %vm530_vm5, %v1271_v18, 0.0 }
 0x32a   :  { %v567_v28 = vsel %vm530_vm5, %v1273_v24, 0.0  ;;  %v1747_v31 = vpop.eup %1274 }
 0x32b   :  { %v568_v14 = vadd.f32 %v567_v28, %v566_v16  ;;  %v1277_v32 = vpop.eup %1276  ;;  %v823_v30 = vsel %vm530_vm5, %v1747_v31, 0.0 }
 0x32c   :  { %v824_v29 = vsel %vm530_vm5, %v1277_v32, 0.0 }
 0x32d   :  { %v569_v33 = vrot.slane %v568_v14, 4  ;;  %v825_v36 = vadd.f32 %v824_v29, %v823_v30 }
 0x32f   :  { %v570_v34 = vadd.f32 %v569_v33, %v568_v14  ;;  %v826_v38 = vrot.slane %v825_v36, 4 }
 0x331   :  { %v571_v37 = vrot.slane %v570_v34, 2  ;;  %v827_v40 = vadd.f32 %v826_v38, %v825_v36 }
 0x333   :  { %v572_v39 = vadd.f32 %v571_v37, %v570_v34  ;;  %v828_v42 = vrot.slane %v827_v40, 2 }
 0x335   :  { %v573_v41 = vrot.slane %v572_v39, 1  ;;  %v829_v23 = vadd.f32 %v828_v42, %v827_v40 }
 0x337   :  { %v574_v10 = vadd.f32 %v573_v41, %v572_v39  ;;  %v830_v49 = vrot.slane %v829_v23, 1 }
 0x339   :  { %v575_v22 = vmax.f32 %v574_v10, 1e-09  ;;  %v831_v53 = vadd.f32 %v830_v49, %v829_v23  ;;  %v655_v10 = vmul.f32 %v1733_v55, %v1728_v26 }
 0x33b   :  { %v832_v52 = vmax.f32 %v831_v53, 1e-09 }
 0x36f   :  { %v548_v47 = vpop.xlane.xlu0 %547 }
 0x370   :  { %v550_v48 = vmax.f32 %v548_v47, 1e-09  ;;  %v604_v47 = vsub.f32 1.0, %v1711_v45 }
 0x372   :  { %1278 = vrcp.f32 %v550_v48 }
 0x373   :  { %v545_v50 = vpop.xlane.xlu0 %544  ;;  %1280 = vrcp.f32 %v575_v22 }
 0x374   :  { %v549_v51 = vmax.f32 %v545_v50, 1e-09  ;;  %v603_v50 = vsub.f32 1.0, %v1728_v26 }
 0x376   :  { %1282 = vrcp.f32 %v549_v51  ;;  %v1091_v51 = vld [vmem:[%s1885_s5 + $0x10] sm:$0xff] }
 0x377   :  { %v805_v54 = vpop.xlane.xlu0 %804 }
 0x378   :  { %v807_v56 = vmax.f32 %v805_v54, 1e-09  ;;  %v657_v54 = vsel %vm530_vm5, %v655_v10, 0.0 }
 0x37a   :  { %1284 = vrcp.f32 %v807_v56  ;;  %v921_v56 = vmul.f32 %v1638_v21, %v1091_v51 }
 0x37b   :  { %v802_v57 = vpop.xlane.xlu0 %801  ;;  %1286 = vrcp.f32 %v832_v52  ;;  %v1781_v52 = vld [vmem:[%s1885_s5 + $0x18] sm:$0xff]  ;;  %s1408_s5 = smov [#allocation4]  }
 0x37c   :  { %v1279_v58 = vpop.eup %1278  ;;  %v806_v59 = vmax.f32 %v802_v57, 1e-09  ;;  %s1028_s3 = sshll.u32 %s1408_s5, 4  ;;  %s1029_s3 = int_to_ptr.vmem [resolvable:$true] %s1028_s3 }
 0x37d   :  { %v578_v60 = vmul.f32 %v1279_v58, %v1679_v2  ;;  %v1281_v61 = vpop.eup %1280  ;;  %s1332_s13 = scalar_lea.vmem %s1029_s3, 512  ;;  %p1337_p1 = scmp.lt.s32.totalorder %s1029_s3, %s1029_s3 }
 0x37e   :  { %1288 = vrcp.f32 %v806_v59  ;;  %p1333_p0 = scmp.ne.s32.totalorder %s1029_s3, %s1332_s13  ;;  %p1338_p2 = scmp.lt.s32.totalorder %s1332_s13, %s1332_s13 }
 0x37f   :  { %v580_v62 = vmul.f32 %v1273_v24, %v578_v60 }
 0x380   :  { %v1283_v63 = vpop.eup %1282  ;;  %p1339_p3 = por %p1338_p2, %p1337_p1 }
 0x381   :  { %v582_v0 = vmul.f32 %v1281_v61, %v580_v62  ;;  %v577_v1 = vmul.f32 %v1283_v63, %v1683_v6 }
 0x382   :  { %p1340_p4 = pnand %p1339_p3, %p1333_p0 }
 0x383   :  { %v584_v3 = vmul.f32 %v582_v0, %v1602_v8  ;;  %v579_v4 = vmul.f32 %v1271_v18, %v577_v1 }
 0x384   :  { %v1285_v5 = vpop.eup %1284  ;;  %v642_v7 = vpop.xlane.xlu0 %641 }
 0x385   :  { %586 = vst.msk [vmem:[#allocation6 + $0x8] sm:$0xff] %vm530_vm5, %v584_v3  ;;  %v581_v11 = vmul.f32 %v1281_v61, %v579_v4  ;;  %v835_v12 = vmul.f32 %v1285_v5, %v1687_v17  ;;  %v644_v2 = vsub.f32 %v1700_v27, %v642_v7  ;;  %v588_v20 = vmax.f32 %v584_v3, 1e-06  ;;  %v1287_v13 = vpop.eup %1286 }
 0x386   :  { %v861_v4 = vsub.f32 1.0, %v1091_v51  ;;  %v862_v5 = vsub.f32 1.0, %v1781_v52 }
 0x387   :  { %v583_v15 = vmul.f32 %v581_v11, %v1607_v9  ;;  %v837_v35 = vmul.f32 %v1277_v32, %v835_v12  ;;  %v647_v24 = vmul.f32 1.442695, %v644_v2  ;;  %v590_v16 = vmin.f32 %v588_v20, 0.999999 }
 0x388   :  { %v1289_v6 = vpop.eup %1288  ;;  %v897_v28 = vpop.xlane.xlu0 %896 }
 0x389   :  { %585 = vst.msk [vmem:[#allocation6] sm:$0xff] %vm530_vm5, %v583_v15  ;;  %v839_v18 = vmul.f32 %v1287_v13, %v837_v35  ;;  %v834_v14 = vmul.f32 %v1289_v6, %v1692_v25  ;;  %1290 = vpow2.f32 %v647_v24  ;;  %v901_v33 = vsub.f32 %v1706_v43, %v897_v28 }
 0x38a   :  { %v587_v17 = vmax.f32 %v583_v15, 1e-06  ;;  %v592_v30 = vsub.f32 1.0, %v590_v16  ;;  %1292 = vlog2.f32 %v590_v16  ;;  %v923_v15 = vsel %vm530_vm5, %v921_v56, 0.0 }
 0x38b   :  { %v841_v27 = vmul.f32 %v1631_v19, %v839_v18  ;;  %v836_v29 = vmul.f32 %v1747_v31, %v834_v14  ;;  %v903_v34 = vmul.f32 1.442695, %v901_v33  ;;  %v881_v35 = vadd.f32 %v1638_v21, %v1607_v9 }
 0x38c   :  { %v900_v32 = vpop.xlane.xlu0 %899  ;;  %v589_v36 = vmin.f32 %v587_v17, 0.999999  ;;  %1294 = vlog2.f32 %v592_v30  ;;  %v594_v57 = vmul.f32 %v592_v30, %v592_v30  ;;  %v922_v56 = vmul.f32 %v1631_v19, %v1781_v52 }
 0x38d   :  { %844 = vst.msk [vmem:[#allocation6 + $0x18] sm:$0xff] %vm530_vm5, %v841_v27  ;;  %v838_v37 = vmul.f32 %v1287_v13, %v836_v29  ;;  %1296 = vpow2.f32 %v903_v34  ;;  %v846_v38 = vmax.f32 %v841_v27, 1e-06  ;;  %v902_v25 = vsub.f32 %v1717_v46, %v900_v32 }
 0x38e   :  { %v591_v39 = vsub.f32 1.0, %v589_v36  ;;  %1298 = vlog2.f32 %v589_v36  ;;  %v606_v46 = vmul.f32 %v590_v16, %v590_v16  ;;  %v605_v59 = vmul.f32 %v589_v36, %v589_v36 }
 0x38f   :  { %v840_v43 = vmul.f32 %v1638_v21, %v838_v37  ;;  %v848_v40 = vmin.f32 %v846_v38, 0.999999  ;;  %v905_v42 = vmul.f32 1.442695, %v902_v25  ;;  %v596_v20 = vmul.f32 %v594_v57, %v1711_v45 }
 0x390   :  { %1300 = vlog2.f32 %v591_v39  ;;  %v608_v60 = vmul.f32 %v606_v46, %v604_v47  ;;  %v593_v62 = vmul.f32 %v591_v39, %v591_v39  ;;  %v607_v24 = vmul.f32 %v605_v59, %v603_v50 }
 0x391   :  { %843 = vst.msk [vmem:[#allocation6 + $0x10] sm:$0xff] %vm530_vm5, %v840_v43  ;;  %v845_v31 = vmax.f32 %v840_v43, 1e-06  ;;  %v850_v41 = vsub.f32 1.0, %v848_v40  ;;  %1302 = vlog2.f32 %v848_v40  ;;  %v864_v7 = vmul.f32 %v848_v40, %v848_v40 }
 0x392   :  { %v595_v28 = vmul.f32 %v593_v62, %v1728_v26  ;;  %v968_v26 = vsel %vm530_vm5, %v881_v35, 0.0 }
 0x393   :  { %v1291_v23 = vpop.eup %1290  ;;  %v847_v48 = vmin.f32 %v845_v31, 0.999999  ;;  %1304 = vlog2.f32 %v850_v41  ;;  %v852_v2 = vmul.f32 %v850_v41, %v850_v41  ;;  %v866_v29 = vmul.f32 %v864_v7, %v862_v5 }
 0x394   :  { %v652_v22 = vsel %vm530_vm5, %v1291_v23, 0.0  ;;  %v1293_v49 = vpop.eup %1292  ;;  %v656_v0 = vmul.f32 %v1291_v23, %v1711_v45 }
 0x395   :  { %653 = vadd.xlane.f32.xlu0 %v652_v22  ;;  %v849_v53 = vsub.f32 1.0, %v847_v48  ;;  %1306 = vlog2.f32 %v847_v48  ;;  %v600_v1 = vmul.f32 0.6931472, %v1293_v49  ;;  %v863_v45 = vmul.f32 %v847_v48, %v847_v48 }
 0x396   :  { %v1295_v55 = vpop.eup %1294  ;;  %1308 = vpow2.f32 %v905_v42  ;;  %v660_v18 = vsel %vm530_vm5, %v656_v0, 0.0  ;;  %v854_v34 = vmul.f32 %v1781_v52, %v852_v2 }
 0x397   :  { %v1297_v58 = vpop.eup %1296  ;;  %1310 = vlog2.f32 %v849_v53  ;;  %v612_v61 = vmul.f32 0.6931472, %v1295_v55  ;;  %v602_v33 = vmul.f32 %v600_v1, %v596_v20  ;;  %v851_v30 = vmul.f32 %v849_v53, %v849_v53 }
 0x398   :  { %v913_v63 = vmul.f32 %v1297_v58, %v1091_v51  ;;  %v1299_v3 = vpop.eup %1298  ;;  %v907_v25 = vsel %vm530_vm5, %v1297_v58, 0.0  ;;  %v865_v23 = vmul.f32 %v863_v45, %v861_v4 }
 0x399   :  { %658 = vadd.xlane.f32.xlu0 %v657_v54  ;;  %v614_v13 = vmul.f32 %v612_v61, %v608_v60  ;;  %v598_v14 = vmul.f32 0.6931472, %v1299_v3  ;;  %v853_v10 = vmul.f32 %v1091_v51, %v851_v30 }
 0x39a   :  { %v1301_v11 = vpop.eup %1300  ;;  %v915_v12 = vsel %vm530_vm5, %v913_v63, 0.0  ;;  %v926_v63 = vsel %vm530_vm5, %v922_v56, 0.0 }
 0x39b   :  { %916 = vadd.xlane.f32.xlu1 %v915_v12  ;;  %v610_v16 = vmul.f32 0.6931472, %v1301_v11  ;;  %v1303_v6 = vpop.eup %1302  ;;  %v616_v36 = vadd.f32 %v614_v13, %v602_v33  ;;  %v601_v43 = vmul.f32 %v598_v14, %v595_v28 }
 0x39c   :  { %v858_v27 = vmul.f32 0.6931472, %v1303_v6 }
 0x39d   :  { %v1305_v17 = vpop.eup %1304  ;;  %661 = vadd.xlane.f32.xlu0 %v660_v18  ;;  %v613_v32 = vmul.f32 %v610_v16, %v607_v24  ;;  %v618_v46 = vmul.f32 -0.25, %v616_v36 }
 0x39e   :  { %v870_v37 = vmul.f32 0.6931472, %v1305_v17  ;;  %v860_v31 = vmul.f32 %v858_v27, %v854_v34 }
 0x39f   :  { %v1307_v38 = vpop.eup %1306  ;;  %924 = vadd.xlane.f32.xlu1 %v923_v15  ;;  %v615_v47 = vadd.f32 %v613_v32, %v601_v43  ;;  %v620_v58 = vmul.f32 %v618_v46, %v1602_v8 }
 0x3a0   :  { %v1309_v39 = vpop.eup %1308  ;;  %v856_v40 = vmul.f32 0.6931472, %v1307_v38  ;;  %v872_v41 = vmul.f32 %v870_v37, %v866_v29 }
 0x3a1   :  { %v1311_v42 = vpop.eup %1310  ;;  %908 = vadd.xlane.f32.xlu0 %v907_v25  ;;  %v910_v49 = vsel %vm530_vm5, %v1309_v39, 0.0  ;;  %v914_v50 = vmul.f32 %v1309_v39, %v1781_v52  ;;  %v617_v57 = vmul.f32 -0.25, %v615_v47  ;;  %v882_v52 = vadd.f32 %v1631_v19, %v1602_v8 }
 0x3a2   :  { %v868_v48 = vmul.f32 0.6931472, %v1311_v42  ;;  %v874_v22 = vadd.f32 %v872_v41, %v860_v31  ;;  %v859_v53 = vmul.f32 %v856_v40, %v853_v10 }
 0x3a3   :  { %969 = vadd.xlane.f32.xlu1 %v968_v26  ;;  %v918_v60 = vsel %vm530_vm5, %v914_v50, 0.0  ;;  %v619_v0 = vmul.f32 %v617_v57, %v1607_v9  ;;  %v971_v5 = vsel %vm530_vm5, %v882_v52, 0.0 }
 0x3a4   :  { %v871_v55 = vmul.f32 %v868_v48, %v865_v23  ;;  %v876_v54 = vmul.f32 -0.25, %v874_v22 }
 0x3a5   :  { %911 = vadd.xlane.f32.xlu0 %v910_v49 }
 0x3a6   :  { %v873_v51 = vadd.f32 %v871_v55, %v859_v53  ;;  %v878_v59 = vmul.f32 %v1631_v19, %v876_v54 }
 0x3a8   :  { %v875_v61 = vmul.f32 -0.25, %v873_v51  ;;  %v880_v62 = vadd.f32 %v878_v59, %v620_v58 }
 0x3a9   :  { %919 = vadd.xlane.f32.xlu0 %v918_v60 }
 0x3aa   :  { %v877_v1 = vmul.f32 %v1638_v21, %v875_v61  ;;  %v958_v7 = vsel %vm530_vm5, %v880_v62, 0.0 }
 0x3ac   :  { %v879_v3 = vadd.f32 %v877_v1, %v619_v0 }
 0x3ad   :  { %927 = vadd.xlane.f32.xlu0 %v926_v63 }
 0x3ae   :  { %v955_v4 = vsel %vm530_vm5, %v879_v3, 0.0 }
 0x3af   :  { %956 = vadd.xlane.f32.xlu1 %v955_v4 }
 0x3b1   :  { %972 = vadd.xlane.f32.xlu0 %v971_v5 }
 0x3b5   :  { %959 = vadd.xlane.f32.xlu0 %v958_v7 }
 0x3b6   :  { %1343 = shalt.err (!%p1340_p4)
}
 0x3b7   :  { %s1344_s16 = scalar_lea.hbm %s1888_s8, 512 }
 0x3b8   :  { %p1345_p5 = scmp.ne.s32.totalorder %s1888_s8, %s1344_s16  ;;  %p1348_p6 = scmp.lt.u32.totalorder %s1344_s16, %s1888_s8 }
 0x3ba   :  { %p1350_p7 = pnand %p1348_p6, %p1345_p5 }
 0x3bc   :  { %1353 = shalt.err (!%p1350_p7)
}
 0x3bd   :  { %s1410_s20 = smov 128   ;;  %s1411_s21 = smov 8  }
 0x3be   :  { %1034 = dma.vmem_to_hbm [thread:$0]  %s1029_s3, 512, %s1888_s8, [#allocation5], %s1410_s20, %s1410_s20, %s1411_s21  }
 0x3bf   :  { %s1354_s23 = scalar_lea.vmem %s1017_s12, 512  ;;  %p1359_p9 = scmp.lt.s32.totalorder %s1017_s12, %s1017_s12 }
 0x3c0   :  { %p1355_p8 = scmp.ne.s32.totalorder %s1017_s12, %s1354_s23  ;;  %p1360_p10 = scmp.lt.s32.totalorder %s1354_s23, %s1354_s23 }
 0x3c2   :  { %p1361_p11 = por %p1360_p10, %p1359_p9 }
 0x3c4   :  { %p1362_p12 = pnand %p1361_p11, %p1355_p8 }
 0x3c6   :  { %1365 = shalt.err (!%p1362_p12)
}
 0x3c7   :  { %s1366_s25 = scalar_lea.hbm %s1887_s7, 512 }
 0x3c8   :  { %p1367_p13 = scmp.ne.s32.totalorder %s1887_s7, %s1366_s25  ;;  %p1370_p0 = scmp.lt.u32.totalorder %s1366_s25, %s1887_s7 }
 0x3ca   :  { %p1372_p1 = pnand %p1370_p0, %p1367_p13 }
 0x3cc   :  { %1375 = shalt.err (!%p1372_p1)
}
 0x3cd   :  { %1022 = dma.vmem_to_hbm [thread:$0]  %s1017_s12, 512, %s1887_s7, [#allocation3], %s1410_s20, %s1410_s20, %s1411_s21  }
 0x3ce   :  { %s1412_s0 = smov [#allocation6]  }
 0x3cf   :  { %s1042_s2 = sshll.u32 %s1412_s0, 4  ;;  %s1043_s2 = int_to_ptr.vmem [resolvable:$true] %s1042_s2 }
 0x3d0   :  { %s1376_s5 = scalar_lea.vmem %s1043_s2, 512  ;;  %p1381_p3 = scmp.lt.s32.totalorder %s1043_s2, %s1043_s2 }
 0x3d1   :  { %p1377_p2 = scmp.ne.s32.totalorder %s1043_s2, %s1376_s5  ;;  %p1382_p4 = scmp.lt.s32.totalorder %s1376_s5, %s1376_s5 }
 0x3d3   :  { %p1383_p5 = por %p1382_p4, %p1381_p3 }
 0x3d5   :  { %p1384_p6 = pnand %p1383_p5, %p1377_p2 }
 0x3d7   :  { %1387 = shalt.err (!%p1384_p6)
}
 0x3d8   :  { %s1388_s13 = scalar_lea.hbm %s1890_s10, 512 }
 0x3d9   :  { %p1389_p7 = scmp.ne.s32.totalorder %s1890_s10, %s1388_s13  ;;  %p1392_p8 = scmp.lt.u32.totalorder %s1388_s13, %s1890_s10 }
 0x3db   :  { %p1394_p9 = pnand %p1392_p8, %p1389_p7 }
 0x3dd   :  { %1397 = shalt.err (!%p1394_p9)
}
 0x3de   :  { %1048 = dma.vmem_to_hbm [thread:$0]  %s1043_s2, 512, %s1890_s10, [#allocation5], %s1410_s20, %s1410_s20, %s1411_s21   ;;  %v1855_v8 = vpop.xlane.xlu0 %669  ;;  %v1857_v21 = vpop.xlane.xlu1 %666  ;;  %vm1006_vm13 = vcmask 1040384   ;;  %vm1008_vm14 = vcmask 1041408  }
 0x3df   :  { %vm671_vm9 = vcmp.gt.f32.partialorder %v1857_v21, 0.0  ;;  %vm672_vm11 = vcmp.gt.f32.partialorder %v1855_v8, 0.0 }
 0x3e0   :  { %v1089_v45 = vsel %vm671_vm9, 1.0, %v1405_v44  ;;  %v1090_v36 = vsel %vm672_vm11, 1.0, %v1405_v44 }
 0x3e2   :  { %v651_v9 = vpop.xlane.xlu0 %650 }
 0x3e3   :  { %v673_v16 = vmax.f32 %v651_v9, 1e-09 }
 0x422   :  { %v654_v19 = vpop.xlane.xlu0 %653 }
 0x423   :  { %v674_v6 = vmax.f32 %v654_v19, 1e-09 }
 0x426   :  { %v659_v11 = vpop.xlane.xlu0 %658 }
 0x427   :  { %v679_v20 = vmax.f32 %v659_v11, 1e-09 }
 0x428   :  { %v917_v2 = vpop.xlane.xlu1 %916 }
 0x429   :  { %v937_v13 = vmax.f32 %v917_v2, 1e-09  ;;  %1312 = vlog2.f32 %v679_v20 }
 0x42a   :  { %v662_v12 = vpop.xlane.xlu0 %661 }
 0x42b   :  { %v680_v35 = vmax.f32 %v662_v12, 1e-09 }
 0x42c   :  { %v925_v14 = vpop.xlane.xlu1 %924 }
 0x42d   :  { %vm929_vm10 = vcmp.gt.f32.partialorder %v925_v14, 0.0 }
 0x42e   :  { %v909_v15 = vpop.xlane.xlu0 %908  ;;  %v1099_v27 = vsel %vm929_vm10, 1.0, %v1405_v44 }
 0x42f   :  { %v931_v24 = vmax.f32 %v909_v15, 1e-09  ;;  %v953_v26 = vadd.f32 %v1099_v27, %v1089_v45 }
 0x430   :  { %v970_v37 = vpop.xlane.xlu1 %969 }
 0x431   :  { %1314 = vlog2.f32 %v931_v24 }
 0x432   :  { %1316 = vlog2.f32 %v937_v13  ;;  %v912_v28 = vpop.xlane.xlu0 %911 }
 0x433   :  { %1318 = vlog2.f32 %v680_v35  ;;  %v932_v18 = vmax.f32 %v912_v28, 1e-09  ;;  %v1313_v30 = vpop.eup %1312 }
 0x434   :  { %1320 = vlog2.f32 %v673_v16  ;;  %v682_v23 = vmul.f32 0.6931472, %v1313_v30 }
 0x435   :  { %1322 = vlog2.f32 %v674_v6 }
 0x436   :  { %v920_v33 = vpop.xlane.xlu0 %919  ;;  %1324 = vlog2.f32 %v932_v18 }
 0x437   :  { %v938_v17 = vmax.f32 %v920_v33, 1e-09 }
 0x439   :  { %1326 = vlog2.f32 %v938_v17 }
 0x43a   :  { %v928_v29 = vpop.xlane.xlu0 %927 }
 0x43b   :  { %v1315_v34 = vpop.eup %1314  ;;  %vm930_vm12 = vcmp.gt.f32.partialorder %v928_v29, 0.0 }
 0x43c   :  { %v1317_v32 = vpop.eup %1316  ;;  %v1100_v38 = vsel %vm930_vm12, 1.0, %v1405_v44  ;;  %v934_v40 = vmul.f32 0.6931472, %v1315_v34  ;;  %v957_v54 = vpop.xlane.xlu1 %956 }
 0x43d   :  { %v1319_v25 = vpop.eup %1318  ;;  %v954_v39 = vadd.f32 %v1100_v38, %v1090_v36  ;;  %v940_v47 = vmul.f32 0.6931472, %v1317_v32 }
 0x43e   :  { %v1321_v43 = vpop.eup %1320  ;;  %v973_v31 = vpop.xlane.xlu0 %972  ;;  %v684_v48 = vmul.f32 0.6931472, %v1319_v25 }
 0x43f   :  { %v1323_v41 = vpop.eup %1322  ;;  %v988_v42 = vadd.f32 %v954_v39, %v953_v26  ;;  %v974_v10 = vadd.f32 %v973_v31, %v970_v37  ;;  %v676_v50 = vmul.f32 0.6931472, %v1321_v43  ;;  %v943_v55 = vsub.f32 %v934_v40, %v940_v47 }
 0x440   :  { %v1325_v46 = vpop.eup %1324  ;;  %v678_v53 = vmul.f32 0.6931472, %v1323_v41 }
 0x441   :  { %v989_v22 = vrot.slane %v988_v42, 4  ;;  %v975_v49 = vrot.slane %v974_v10, 4  ;;  %v685_v59 = vsub.f32 %v676_v50, %v682_v23  ;;  %v936_v60 = vmul.f32 0.6931472, %v1325_v46 }
 0x442   :  { %v960_v44 = vpop.xlane.xlu0 %959  ;;  %v686_v62 = vsub.f32 %v678_v53, %v684_v48  ;;  %v945_v1 = vsel %vm929_vm10, %v943_v55, 0.0 }
 0x443   :  { %v1327_v56 = vpop.eup %1326  ;;  %v990_v57 = vadd.f32 %v989_v22, %v988_v42  ;;  %v976_v51 = vadd.f32 %v975_v49, %v974_v10  ;;  %v961_v58 = vadd.f32 %v960_v44, %v957_v54  ;;  %v687_v7 = vsel %vm671_vm9, %v685_v59, 0.0 }
 0x444   :  { %v942_v61 = vmul.f32 0.6931472, %v1327_v56  ;;  %v688_v9 = vsel %vm672_vm11, %v686_v62, 0.0  ;;  %v947_v11 = vadd.f32 %v945_v1, %v687_v7 }
 0x445   :  { %v991_v63 = vrot.slane %v990_v57, 2  ;;  %v977_v0 = vrot.slane %v976_v51, 2  ;;  %v962_v3 = vrot.slane %v961_v58, 4 }
 0x446   :  { %v944_v52 = vsub.f32 %v936_v60, %v942_v61 }
 0x447   :  { %v992_v4 = vadd.f32 %v991_v63, %v990_v57  ;;  %v978_v5 = vadd.f32 %v977_v0, %v976_v51  ;;  %v963_v13 = vadd.f32 %v962_v3, %v961_v58 }
 0x448   :  { %v946_v19 = vsel %vm930_vm12, %v944_v52, 0.0 }
 0x449   :  { %v948_v12 = vadd.f32 %v946_v19, %v688_v9  ;;  %v993_v2 = vrot.slane %v992_v4, 1  ;;  %v979_v20 = vrot.slane %v978_v5, 1  ;;  %v964_v18 = vrot.slane %v963_v13, 2 }
 0x44b   :  { %v981_v15 = vadd.f32 %v948_v12, %v947_v11  ;;  %v994_v35 = vadd.f32 %v993_v2, %v992_v4  ;;  %v980_v24 = vadd.f32 %v979_v20, %v978_v5  ;;  %v965_v8 = vadd.f32 %v964_v18, %v963_v13 }
 0x44d   :  { %v982_v16 = vrot.slane %v981_v15, 4  ;;  %v998_v6 = vmax.f32 %v994_v35, 1.0  ;;  %v995_v28 = vmax.f32 %v980_v24, 1.0  ;;  %v966_v30 = vrot.slane %v965_v8, 1 }
 0x44f   :  { %v983_v14 = vadd.f32 %v982_v16, %v981_v15  ;;  %1328 = vrcp.f32 %v998_v6  ;;  %v967_v32 = vadd.f32 %v966_v30, %v965_v8 }
 0x450   :  { %1330 = vrcp.f32 %v995_v28 }
 0x451   :  { %v984_v21 = vrot.slane %v983_v14, 2 }
 0x453   :  { %v985_v33 = vadd.f32 %v984_v21, %v983_v14 }
 0x455   :  { %v986_v17 = vrot.slane %v985_v33, 1 }
 0x457   :  { %v987_v45 = vadd.f32 %v986_v17, %v985_v33 }
 0x459   :  { %v1329_v27 = vpop.eup %1328 }
 0x45a   :  { %v1331_v29 = vpop.eup %1330  ;;  %v1000_v34 = vmul.f32 %v1329_v27, %v987_v45 }
 0x45b   :  { %v997_v37 = vmul.f32 %v1331_v29, %v967_v32 }
 0x45c   :  { %v1001_v36 = vmul.f32 0.1, %v1000_v34 }
 0x45e   :  { %v1002_v38 = vadd.f32 %v1001_v36, %v997_v37 }
 0x460   :  { %v1007_v25 = vsel %vm1006_vm13, %v1002_v38, %v997_v37 }
 0x461   :  { %v1009_v26 = vsel %vm1008_vm14, %v1007_v25, %v1000_v34 }
 0x462   :  { %1010 = vst [vmem:[%s1891_s11] sm:$0x7] %v1009_v26 }
 0x463   :  { %1398 = dma.done.wait [#allocation3], 512  }
 0x464   :  { %1399 = vsyncadd [#allocation3], 4294966784 }
 0x465   :  { %1400 = dma.done.wait [#allocation5], 1024  }
 0x466   :  { %1401 = vsyncadd [#allocation5], 4294966272 }
 0x467   :  { %1064 = vsyncpa [#allocation3], 1 }
 0x468   :  { %1065 = vsyncpa [#allocation5], 1 }

</bundles_post_ra>
